<compile_context>
chip_gen: v7x
topology: tpu7x:2x2x1
jax: 0.10.0
libtpu: 0.0.40
codegen_flags: <defaults>
</compile_context>

<pallas_src>
import functools

import jax
import jax.numpy as jnp
from jax import lax
from jax.experimental import pallas as pl
from jax.experimental.pallas import tpu as pltpu


def _dwconv_bn_relu_kernel(x_ref, w_ref, scale_ref, shift_ref, o_ref, s_ref, *,
                           stride, h_out, w_out, hs, ws, row_tile):
    # x_ref:     (1, s*s, hs, ws, Ct)  polyphase NHWC input (one batch element,
    #                                  one channel tile); for stride=1 this is
    #                                  just (1, 1, H, W, Ct).
    # w_ref:     (3, 3, Ct)            depthwise taps
    # scale_ref / shift_ref: (1, Ct)   fused conv-bias + eval-BN affine
    # o_ref:     (1, h_out, w_out, Ct)
    # s_ref:     VMEM (s*s, hs + 2//s, ws + 2//s, Ct) zero-padded phase scratch
    s = stride
    ph_rows = hs + 2 // s
    ph_cols = ws + 2 // s
    ct = o_ref.shape[-1]
    dt = s_ref.dtype

    # ---- Build the zero-padded polyphase image in VMEM -------------------
    # Invariant: s_ref[p*s + q, i, j, :] == xpad[s*i + p, s*j + q, :]
    # where xpad is the pad=1 zero-padded image.  All tap reads below are
    # contiguous slices of this scratch (no strided indexing anywhere).
    for p in range(s):
        a = (p - 1) % s                 # source row phase in the input
        off_h = (a + 1 - p) // s        # row offset of valid data in scratch
        for q in range(s):
            b = (q - 1) % s
            off_w = (b + 1 - q) // s
            dst = p * s + q
            src = a * s + b
            # Zero only the halo rows / cols (interior is overwritten below).
            if off_h > 0:
                s_ref[dst, 0:off_h, :, :] = jnp.zeros((off_h, ph_cols, ct), dt)
            if off_h + hs < ph_rows:
                nz = ph_rows - (off_h + hs)
                s_ref[dst, off_h + hs:ph_rows, :, :] = jnp.zeros(
                    (nz, ph_cols, ct), dt)
            if off_w > 0:
                s_ref[dst, :, 0:off_w, :] = jnp.zeros((ph_rows, off_w, ct), dt)
            if off_w + ws < ph_cols:
                nz = ph_cols - (off_w + ws)
                s_ref[dst, :, off_w + ws:ph_cols, :] = jnp.zeros(
                    (ph_rows, nz, ct), dt)
            s_ref[dst, off_h:off_h + hs, off_w:off_w + ws, :] = x_ref[0, src]

    # ---- 9-tap depthwise conv + fused BN/ReLU, one row tile at a time ----
    w_taps = w_ref[...].astype(jnp.float32)        # (3, 3, Ct), hoisted
    scale = scale_ref[0, :][None, None, :]         # (1, 1, Ct), f32
    shift = shift_ref[0, :][None, None, :]

    for r0 in range(0, h_out, row_tile):
        rt = min(row_tile, h_out - r0)
        acc = None                                  # init with first tap
        for kh in range(3):
            p, dh = kh % s, kh // s
            for kw in range(3):
                q, dw = kw % s, kw // s
                win = s_ref[p * s + q,
                            dh + r0:dh + r0 + rt,
                            dw:dw + w_out, :].astype(jnp.float32)
                contrib = win * w_taps[kh, kw][None, None, :]
                acc = contrib if acc is None else acc + contrib
        y = acc * scale + shift
        o_ref[0, r0:r0 + rt, :, :] = jnp.maximum(y, 0.0).astype(o_ref.dtype)


def depthwise_conv_bn_relu(x_nchw, w_dw, b_dw, gamma, beta, run_mean, run_var,
                           *, stride, eps=1e-5, row_tile=8):
    """x_nchw: (N, C, H, W); w_dw: (C, 1, 3, 3) PyTorch depthwise weight."""
    n, c, h, w = x_nchw.shape
    s = stride
    assert s in (1, 2), "MobileNet depthwise conv uses stride 1 or 2"
    assert h % s == 0 and w % s == 0
    h_out = (h + 2 - 3) // s + 1
    w_out = (w + 2 - 3) // s + 1
    hs, ws = h // s, w // s

    # Single layout transform: NCHW -> (N, phase, H/s, W/s, C) polyphase NHWC.
    # For stride=1 this is exactly the NCHW->NHWC transpose (no extra pass),
    # and there is no HBM-side jnp.pad anywhere.
    xph = x_nchw.reshape(n, c, hs, s, ws, s)
    xph = jnp.transpose(xph, (0, 3, 5, 2, 4, 1)).reshape(n, s * s, hs, ws, c)

    # (C, 1, 3, 3) -> (3, 3, C)
    w_taps = jnp.transpose(w_dw[:, 0, :, :], (1, 2, 0)).astype(jnp.float32)

    # Fuse conv-bias + eval-mode BN into a per-channel affine:
    #   out = relu(conv * scale + shift)
    scale = (gamma / jnp.sqrt(run_var + eps)).astype(jnp.float32)
    shift = ((b_dw - run_mean) * scale + beta).astype(jnp.float32)
    scale = scale.reshape(1, c)
    shift = shift.reshape(1, c)

    # Lane-dense channel tiles (128) when possible, otherwise full C
    # (legal via the "full array dim" escape of the (8,128) rule).
    c_tile = 128 if c % 128 == 0 else c
    n_ct = c // c_tile

    kernel = functools.partial(
        _dwconv_bn_relu_kernel, stride=s, h_out=h_out, w_out=w_out,
        hs=hs, ws=ws, row_tile=min(row_tile, h_out))

    out_nhwc = pl.pallas_call(
        kernel,
        out_shape=jax.ShapeDtypeStruct((n, h_out, w_out, c), x_nchw.dtype),
        grid_spec=pltpu.PrefetchScalarGridSpec(
            num_scalar_prefetch=0,
            grid=(n, n_ct),                 # batch x channel-tiles, all parallel
            in_specs=[
                pl.BlockSpec((1, s * s, hs, ws, c_tile),
                             lambda i, j: (i, 0, 0, 0, j)),
                pl.BlockSpec((3, 3, c_tile), lambda i, j: (0, 0, j)),
                pl.BlockSpec((1, c_tile), lambda i, j: (0, j)),
                pl.BlockSpec((1, c_tile), lambda i, j: (0, j)),
            ],
            out_specs=pl.BlockSpec((1, h_out, w_out, c_tile),
                                   lambda i, j: (i, 0, 0, j)),
            scratch_shapes=[
                pltpu.VMEM((s * s, hs + 2 // s, ws + 2 // s, c_tile),
                           x_nchw.dtype)],
        ),
        compiler_params=pltpu.CompilerParams(
            dimension_semantics=("parallel", "parallel")),
    )(xph, w_taps, scale, shift)

    # Back to PyTorch's NCHW at the module boundary.
    return jnp.transpose(out_nhwc, (0, 3, 1, 2))


def _reference(x, w_dw, b_dw, gamma, beta, run_mean, run_var, *, stride,
               eps=1e-5):
    c = x.shape[1]
    y = lax.conv_general_dilated(
        x, w_dw, window_strides=(stride, stride),
        padding=((1, 1), (1, 1)), feature_group_count=c,
        dimension_numbers=("NCHW", "OIHW", "NCHW"))
    y = y + b_dw[None, :, None, None]
    y = (y - run_mean[None, :, None, None]) / jnp.sqrt(
        run_var[None, :, None, None] + eps)
    y = y * gamma[None, :, None, None] + beta[None, :, None, None]
    return jnp.maximum(y, 0.0)


if __name__ == "__main__":
    key = jax.random.PRNGKey(0)
    ok = True
    # Second config exercises the 128-wide channel-tiling grid axis.
    for (N, C, H, W) in [(2, 32, 16, 16), (1, 256, 8, 8)]:
        key, kx, kw_, kb, kg, kbe, km, kv = jax.random.split(key, 8)
        x = jax.random.normal(kx, (N, C, H, W), jnp.float32)
        w_dw = jax.random.normal(kw_, (C, 1, 3, 3), jnp.float32) * 0.2
        b_dw = jax.random.normal(kb, (C,), jnp.float32) * 0.1
        gamma = jax.random.normal(kg, (C,), jnp.float32) * 0.2 + 1.0
        beta = jax.random.normal(kbe, (C,), jnp.float32) * 0.1
        run_mean = jax.random.normal(km, (C,), jnp.float32) * 0.1
        run_var = jnp.abs(jax.random.normal(kv, (C,), jnp.float32)) * 0.5 + 0.5

        for stride in (1, 2):
            out = depthwise_conv_bn_relu(x, w_dw, b_dw, gamma, beta,
                                         run_mean, run_var, stride=stride)
            out = jax.block_until_ready(out)
            ref = _reference(x, w_dw, b_dw, gamma, beta, run_mean, run_var,
                             stride=stride)
            if out.shape != ref.shape or not jnp.allclose(out, ref, atol=1e-4,
                                                          rtol=1e-4):
                ok = False

    if ok:
        print("KERNEL_OK")
    else:
        print("MISMATCH")
</pallas_src>

<mosaic_0001>
module attributes {stable_mosaic.version = 11 : i64} {
  func.func @_dwconv_bn_relu_kernel(%arg0: i32, %arg1: i32, %arg2: memref<1x1x16x16x32xf32, #tpu.memory_space<vmem>>, %arg3: memref<3x3x32xf32, #tpu.memory_space<vmem>>, %arg4: memref<1x32xf32, #tpu.memory_space<vmem>>, %arg5: memref<1x32xf32, #tpu.memory_space<vmem>>, %arg6: memref<1x16x16x32xf32, #tpu.memory_space<vmem>>, %arg7: memref<1x18x18x32xf32, #tpu.memory_space<vmem>>) attributes {dimension_semantics = [#tpu.dimension_semantics<parallel>, #tpu.dimension_semantics<parallel>], iteration_bounds = array<i64: 2, 1>, scalar_prefetch = 0 : i64, scratch_operands = 1 : i64, tpu.core_type = #tpu.core_type<tc>, window_params = [{transform_indices = @transform_0, window_bounds = array<i64: 1, 1, 16, 16, 32>}, {transform_indices = @transform_1, window_bounds = array<i64: 3, 3, 32>}, {transform_indices = @transform_2, window_bounds = array<i64: 1, 32>}, {transform_indices = @transform_3, window_bounds = array<i64: 1, 32>}, {transform_indices = @transform_4, window_bounds = array<i64: 1, 16, 16, 32>}]} {
    %cst = arith.constant 0.000000e+00 : f32
    %0 = vector.broadcast %cst : f32 to vector<1x18x32xf32>
    %c0 = arith.constant 0 : index
    %c0_0 = arith.constant 0 : index
    %c0_1 = arith.constant 0 : index
    %c0_2 = arith.constant 0 : index
    %1 = vector.load %arg7[%c0, %c0_0, %c0_1, %c0_2] : memref<1x18x18x32xf32, #tpu.memory_space<vmem>>, vector<1x1x18x32xf32>
    %2 = vector.shape_cast %1 : vector<1x1x18x32xf32> to vector<1x18x32xf32>
    %3 = vector.shape_cast %0 : vector<1x18x32xf32> to vector<1x1x18x32xf32>
    tpu.vector_store %arg7[%c0, %c0_0, %c0_1, %c0_2], %3 {strides = array<i32>} : memref<1x18x18x32xf32, #tpu.memory_space<vmem>>, vector<1x1x18x32xf32>,
    %cst_3 = arith.constant 0.000000e+00 : f32
    %4 = vector.broadcast %cst_3 : f32 to vector<1x18x32xf32>
    %c0_4 = arith.constant 0 : index
    %c17 = arith.constant 17 : index
    %c0_5 = arith.constant 0 : index
    %c0_6 = arith.constant 0 : index
    %5 = vector.load %arg7[%c0_4, %c17, %c0_5, %c0_6] : memref<1x18x18x32xf32, #tpu.memory_space<vmem>>, vector<1x1x18x32xf32>
    %6 = vector.shape_cast %5 : vector<1x1x18x32xf32> to vector<1x18x32xf32>
    %7 = vector.shape_cast %4 : vector<1x18x32xf32> to vector<1x1x18x32xf32>
    tpu.vector_store %arg7[%c0_4, %c17, %c0_5, %c0_6], %7 {strides = array<i32>} : memref<1x18x18x32xf32, #tpu.memory_space<vmem>>, vector<1x1x18x32xf32>,
    %cst_7 = arith.constant 0.000000e+00 : f32
    %8 = vector.broadcast %cst_7 : f32 to vector<18x1x32xf32>
    %c0_8 = arith.constant 0 : index
    %c0_9 = arith.constant 0 : index
    %c0_10 = arith.constant 0 : index
    %c0_11 = arith.constant 0 : index
    %9 = vector.load %arg7[%c0_8, %c0_9, %c0_10, %c0_11] : memref<1x18x18x32xf32, #tpu.memory_space<vmem>>, vector<1x18x1x32xf32>
    %10 = vector.shape_cast %9 : vector<1x18x1x32xf32> to vector<18x1x32xf32>
    %11 = vector.shape_cast %8 : vector<18x1x32xf32> to vector<1x18x1x32xf32>
    tpu.vector_store %arg7[%c0_8, %c0_9, %c0_10, %c0_11], %11 {strides = array<i32>} : memref<1x18x18x32xf32, #tpu.memory_space<vmem>>, vector<1x18x1x32xf32>,
    %cst_12 = arith.constant 0.000000e+00 : f32
    %12 = vector.broadcast %cst_12 : f32 to vector<18x1x32xf32>
    %c0_13 = arith.constant 0 : index
    %c0_14 = arith.constant 0 : index
    %c17_15 = arith.constant 17 : index
    %c0_16 = arith.constant 0 : index
    %13 = vector.load %arg7[%c0_13, %c0_14, %c17_15, %c0_16] : memref<1x18x18x32xf32, #tpu.memory_space<vmem>>, vector<1x18x1x32xf32>
    %14 = vector.shape_cast %13 : vector<1x18x1x32xf32> to vector<18x1x32xf32>
    %15 = vector.shape_cast %12 : vector<18x1x32xf32> to vector<1x18x1x32xf32>
    tpu.vector_store %arg7[%c0_13, %c0_14, %c17_15, %c0_16], %15 {strides = array<i32>} : memref<1x18x18x32xf32, #tpu.memory_space<vmem>>, vector<1x18x1x32xf32>,
    %c0_17 = arith.constant 0 : index
    %c0_18 = arith.constant 0 : index
    %c0_19 = arith.constant 0 : index
    %c0_20 = arith.constant 0 : index
    %c0_21 = arith.constant 0 : index
    %16 = vector.load %arg2[%c0_17, %c0_18, %c0_19, %c0_20, %c0_21] : memref<1x1x16x16x32xf32, #tpu.memory_space<vmem>>, vector<1x1x16x16x32xf32>
    %17 = vector.shape_cast %16 : vector<1x1x16x16x32xf32> to vector<16x16x32xf32>
    %c0_22 = arith.constant 0 : index
    %c1 = arith.constant 1 : index
    %c1_23 = arith.constant 1 : index
    %c0_24 = arith.constant 0 : index
    %18 = vector.load %arg7[%c0_22, %c1, %c1_23, %c0_24] : memref<1x18x18x32xf32, #tpu.memory_space<vmem>>, vector<1x16x16x32xf32>
    %19 = vector.shape_cast %18 : vector<1x16x16x32xf32> to vector<16x16x32xf32>
    %20 = vector.shape_cast %17 : vector<16x16x32xf32> to vector<1x16x16x32xf32>
    tpu.vector_store %arg7[%c0_22, %c1, %c1_23, %c0_24], %20 {strides = array<i32>} : memref<1x18x18x32xf32, #tpu.memory_space<vmem>>, vector<1x16x16x32xf32>,
    %c0_25 = arith.constant 0 : index
    %c0_26 = arith.constant 0 : index
    %c0_27 = arith.constant 0 : index
    %21 = vector.load %arg3[%c0_25, %c0_26, %c0_27] : memref<3x3x32xf32, #tpu.memory_space<vmem>>, vector<3x3x32xf32>
    %c0_28 = arith.constant 0 : index
    %c0_29 = arith.constant 0 : index
    %22 = vector.load %arg4[%c0_28, %c0_29] : memref<1x32xf32, #tpu.memory_space<vmem>>, vector<1x32xf32>
    %23 = vector.shape_cast %22 : vector<1x32xf32> to vector<32xf32>
    %24 = vector.shape_cast %23 : vector<32xf32> to vector<1x1x32xf32>
    %c0_30 = arith.constant 0 : index
    %c0_31 = arith.constant 0 : index
    %25 = vector.load %arg5[%c0_30, %c0_31] : memref<1x32xf32, #tpu.memory_space<vmem>>, vector<1x32xf32>
    %26 = vector.shape_cast %25 : vector<1x32xf32> to vector<32xf32>
    %27 = vector.shape_cast %26 : vector<32xf32> to vector<1x1x32xf32>
    %c0_32 = arith.constant 0 : index
    %c0_33 = arith.constant 0 : index
    %c0_34 = arith.constant 0 : index
    %c0_35 = arith.constant 0 : index
    %28 = vector.load %arg7[%c0_32, %c0_33, %c0_34, %c0_35] : memref<1x18x18x32xf32, #tpu.memory_space<vmem>>, vector<1x8x16x32xf32>
    %29 = vector.shape_cast %28 : vector<1x8x16x32xf32> to vector<8x16x32xf32>
    %30 = vector.extract_strided_slice %21 {offsets = [0, 0, 0], sizes = [1, 1, 32], strides = [1, 1, 1]} : vector<3x3x32xf32> to vector<1x1x32xf32>
    %31 = vector.shape_cast %30 : vector<1x1x32xf32> to vector<32xf32>
    %32 = vector.shape_cast %31 : vector<32xf32> to vector<1x1x32xf32>
    %33 = vector.broadcast %32 : vector<1x1x32xf32> to vector<8x16x32xf32>
    %34 = arith.mulf %29, %33 : vector<8x16x32xf32>
    %c0_36 = arith.constant 0 : index
    %c0_37 = arith.constant 0 : index
    %c1_38 = arith.constant 1 : index
    %c0_39 = arith.constant 0 : index
    %35 = vector.load %arg7[%c0_36, %c0_37, %c1_38, %c0_39] : memref<1x18x18x32xf32, #tpu.memory_space<vmem>>, vector<1x8x16x32xf32>
    %36 = vector.shape_cast %35 : vector<1x8x16x32xf32> to vector<8x16x32xf32>
    %37 = vector.extract_strided_slice %21 {offsets = [0, 1, 0], sizes = [1, 1, 32], strides = [1, 1, 1]} : vector<3x3x32xf32> to vector<1x1x32xf32>
    %38 = vector.shape_cast %37 : vector<1x1x32xf32> to vector<32xf32>
    %39 = vector.shape_cast %38 : vector<32xf32> to vector<1x1x32xf32>
    %40 = vector.broadcast %39 : vector<1x1x32xf32> to vector<8x16x32xf32>
    %41 = arith.mulf %36, %40 : vector<8x16x32xf32>
    %42 = arith.addf %34, %41 : vector<8x16x32xf32>
    %c0_40 = arith.constant 0 : index
    %c0_41 = arith.constant 0 : index
    %c2 = arith.constant 2 : index
    %c0_42 = arith.constant 0 : index
    %43 = vector.load %arg7[%c0_40, %c0_41, %c2, %c0_42] : memref<1x18x18x32xf32, #tpu.memory_space<vmem>>, vector<1x8x16x32xf32>
    %44 = vector.shape_cast %43 : vector<1x8x16x32xf32> to vector<8x16x32xf32>
    %45 = vector.extract_strided_slice %21 {offsets = [0, 2, 0], sizes = [1, 1, 32], strides = [1, 1, 1]} : vector<3x3x32xf32> to vector<1x1x32xf32>
    %46 = vector.shape_cast %45 : vector<1x1x32xf32> to vector<32xf32>
    %47 = vector.shape_cast %46 : vector<32xf32> to vector<1x1x32xf32>
    %48 = vector.broadcast %47 : vector<1x1x32xf32> to vector<8x16x32xf32>
    %49 = arith.mulf %44, %48 : vector<8x16x32xf32>
    %50 = arith.addf %42, %49 : vector<8x16x32xf32>
    %c0_43 = arith.constant 0 : index
    %c1_44 = arith.constant 1 : index
    %c0_45 = arith.constant 0 : index
    %c0_46 = arith.constant 0 : index
    %51 = vector.load %arg7[%c0_43, %c1_44, %c0_45, %c0_46] : memref<1x18x18x32xf32, #tpu.memory_space<vmem>>, vector<1x8x16x32xf32>
    %52 = vector.shape_cast %51 : vector<1x8x16x32xf32> to vector<8x16x32xf32>
    %53 = vector.extract_strided_slice %21 {offsets = [1, 0, 0], sizes = [1, 1, 32], strides = [1, 1, 1]} : vector<3x3x32xf32> to vector<1x1x32xf32>
    %54 = vector.shape_cast %53 : vector<1x1x32xf32> to vector<32xf32>
    %55 = vector.shape_cast %54 : vector<32xf32> to vector<1x1x32xf32>
    %56 = vector.broadcast %55 : vector<1x1x32xf32> to vector<8x16x32xf32>
    %57 = arith.mulf %52, %56 : vector<8x16x32xf32>
    %58 = arith.addf %50, %57 : vector<8x16x32xf32>
    %c0_47 = arith.constant 0 : index
    %c1_48 = arith.constant 1 : index
    %c1_49 = arith.constant 1 : index
    %c0_50 = arith.constant 0 : index
    %59 = vector.load %arg7[%c0_47, %c1_48, %c1_49, %c0_50] : memref<1x18x18x32xf32, #tpu.memory_space<vmem>>, vector<1x8x16x32xf32>
    %60 = vector.shape_cast %59 : vector<1x8x16x32xf32> to vector<8x16x32xf32>
    %61 = vector.extract_strided_slice %21 {offsets = [1, 1, 0], sizes = [1, 1, 32], strides = [1, 1, 1]} : vector<3x3x32xf32> to vector<1x1x32xf32>
    %62 = vector.shape_cast %61 : vector<1x1x32xf32> to vector<32xf32>
    %63 = vector.shape_cast %62 : vector<32xf32> to vector<1x1x32xf32>
    %64 = vector.broadcast %63 : vector<1x1x32xf32> to vector<8x16x32xf32>
    %65 = arith.mulf %60, %64 : vector<8x16x32xf32>
    %66 = arith.addf %58, %65 : vector<8x16x32xf32>
    %c0_51 = arith.constant 0 : index
    %c1_52 = arith.constant 1 : index
    %c2_53 = arith.constant 2 : index
    %c0_54 = arith.constant 0 : index
    %67 = vector.load %arg7[%c0_51, %c1_52, %c2_53, %c0_54] : memref<1x18x18x32xf32, #tpu.memory_space<vmem>>, vector<1x8x16x32xf32>
    %68 = vector.shape_cast %67 : vector<1x8x16x32xf32> to vector<8x16x32xf32>
    %69 = vector.extract_strided_slice %21 {offsets = [1, 2, 0], sizes = [1, 1, 32], strides = [1, 1, 1]} : vector<3x3x32xf32> to vector<1x1x32xf32>
    %70 = vector.shape_cast %69 : vector<1x1x32xf32> to vector<32xf32>
    %71 = vector.shape_cast %70 : vector<32xf32> to vector<1x1x32xf32>
    %72 = vector.broadcast %71 : vector<1x1x32xf32> to vector<8x16x32xf32>
    %73 = arith.mulf %68, %72 : vector<8x16x32xf32>
    %74 = arith.addf %66, %73 : vector<8x16x32xf32>
    %c0_55 = arith.constant 0 : index
    %c2_56 = arith.constant 2 : index
    %c0_57 = arith.constant 0 : index
    %c0_58 = arith.constant 0 : index
    %75 = vector.load %arg7[%c0_55, %c2_56, %c0_57, %c0_58] : memref<1x18x18x32xf32, #tpu.memory_space<vmem>>, vector<1x8x16x32xf32>
    %76 = vector.shape_cast %75 : vector<1x8x16x32xf32> to vector<8x16x32xf32>
    %77 = vector.extract_strided_slice %21 {offsets = [2, 0, 0], sizes = [1, 1, 32], strides = [1, 1, 1]} : vector<3x3x32xf32> to vector<1x1x32xf32>
    %78 = vector.shape_cast %77 : vector<1x1x32xf32> to vector<32xf32>
    %79 = vector.shape_cast %78 : vector<32xf32> to vector<1x1x32xf32>
    %80 = vector.broadcast %79 : vector<1x1x32xf32> to vector<8x16x32xf32>
    %81 = arith.mulf %76, %80 : vector<8x16x32xf32>
    %82 = arith.addf %74, %81 : vector<8x16x32xf32>
    %c0_59 = arith.constant 0 : index
    %c2_60 = arith.constant 2 : index
    %c1_61 = arith.constant 1 : index
    %c0_62 = arith.constant 0 : index
    %83 = vector.load %arg7[%c0_59, %c2_60, %c1_61, %c0_62] : memref<1x18x18x32xf32, #tpu.memory_space<vmem>>, vector<1x8x16x32xf32>
    %84 = vector.shape_cast %83 : vector<1x8x16x32xf32> to vector<8x16x32xf32>
    %85 = vector.extract_strided_slice %21 {offsets = [2, 1, 0], sizes = [1, 1, 32], strides = [1, 1, 1]} : vector<3x3x32xf32> to vector<1x1x32xf32>
    %86 = vector.shape_cast %85 : vector<1x1x32xf32> to vector<32xf32>
    %87 = vector.shape_cast %86 : vector<32xf32> to vector<1x1x32xf32>
    %88 = vector.broadcast %87 : vector<1x1x32xf32> to vector<8x16x32xf32>
    %89 = arith.mulf %84, %88 : vector<8x16x32xf32>
    %90 = arith.addf %82, %89 : vector<8x16x32xf32>
    %c0_63 = arith.constant 0 : index
    %c2_64 = arith.constant 2 : index
    %c2_65 = arith.constant 2 : index
    %c0_66 = arith.constant 0 : index
    %91 = vector.load %arg7[%c0_63, %c2_64, %c2_65, %c0_66] : memref<1x18x18x32xf32, #tpu.memory_space<vmem>>, vector<1x8x16x32xf32>
    %92 = vector.shape_cast %91 : vector<1x8x16x32xf32> to vector<8x16x32xf32>
    %93 = vector.extract_strided_slice %21 {offsets = [2, 2, 0], sizes = [1, 1, 32], strides = [1, 1, 1]} : vector<3x3x32xf32> to vector<1x1x32xf32>
    %94 = vector.shape_cast %93 : vector<1x1x32xf32> to vector<32xf32>
    %95 = vector.shape_cast %94 : vector<32xf32> to vector<1x1x32xf32>
    %96 = vector.broadcast %95 : vector<1x1x32xf32> to vector<8x16x32xf32>
    %97 = arith.mulf %92, %96 : vector<8x16x32xf32>
    %98 = arith.addf %90, %97 : vector<8x16x32xf32>
    %99 = vector.broadcast %24 : vector<1x1x32xf32> to vector<8x16x32xf32>
    %100 = arith.mulf %98, %99 : vector<8x16x32xf32>
    %101 = vector.broadcast %27 : vector<1x1x32xf32> to vector<8x16x32xf32>
    %102 = arith.addf %100, %101 : vector<8x16x32xf32>
    %cst_67 = arith.constant 0.000000e+00 : f32
    %103 = vector.broadcast %cst_67 : f32 to vector<8x16x32xf32>
    %104 = arith.maximumf %102, %103 : vector<8x16x32xf32>
    %c0_68 = arith.constant 0 : index
    %c0_69 = arith.constant 0 : index
    %c0_70 = arith.constant 0 : index
    %c0_71 = arith.constant 0 : index
    %105 = vector.load %arg6[%c0_68, %c0_69, %c0_70, %c0_71] : memref<1x16x16x32xf32, #tpu.memory_space<vmem>>, vector<1x8x16x32xf32>
    %106 = vector.shape_cast %105 : vector<1x8x16x32xf32> to vector<8x16x32xf32>
    %107 = vector.shape_cast %104 : vector<8x16x32xf32> to vector<1x8x16x32xf32>
    tpu.vector_store %arg6[%c0_68, %c0_69, %c0_70, %c0_71], %107 {strides = array<i32>} : memref<1x16x16x32xf32, #tpu.memory_space<vmem>>, vector<1x8x16x32xf32>,
    %c0_72 = arith.constant 0 : index
    %c8 = arith.constant 8 : index
    %c0_73 = arith.constant 0 : index
    %c0_74 = arith.constant 0 : index
    %108 = vector.load %arg7[%c0_72, %c8, %c0_73, %c0_74] : memref<1x18x18x32xf32, #tpu.memory_space<vmem>>, vector<1x8x16x32xf32>
    %109 = vector.shape_cast %108 : vector<1x8x16x32xf32> to vector<8x16x32xf32>
    %110 = vector.extract_strided_slice %21 {offsets = [0, 0, 0], sizes = [1, 1, 32], strides = [1, 1, 1]} : vector<3x3x32xf32> to vector<1x1x32xf32>
    %111 = vector.shape_cast %110 : vector<1x1x32xf32> to vector<32xf32>
    %112 = vector.shape_cast %111 : vector<32xf32> to vector<1x1x32xf32>
    %113 = vector.broadcast %112 : vector<1x1x32xf32> to vector<8x16x32xf32>
    %114 = arith.mulf %109, %113 : vector<8x16x32xf32>
    %c0_75 = arith.constant 0 : index
    %c8_76 = arith.constant 8 : index
    %c1_77 = arith.constant 1 : index
    %c0_78 = arith.constant 0 : index
    %115 = vector.load %arg7[%c0_75, %c8_76, %c1_77, %c0_78] : memref<1x18x18x32xf32, #tpu.memory_space<vmem>>, vector<1x8x16x32xf32>
    %116 = vector.shape_cast %115 : vector<1x8x16x32xf32> to vector<8x16x32xf32>
    %117 = vector.extract_strided_slice %21 {offsets = [0, 1, 0], sizes = [1, 1, 32], strides = [1, 1, 1]} : vector<3x3x32xf32> to vector<1x1x32xf32>
    %118 = vector.shape_cast %117 : vector<1x1x32xf32> to vector<32xf32>
    %119 = vector.shape_cast %118 : vector<32xf32> to vector<1x1x32xf32>
    %120 = vector.broadcast %119 : vector<1x1x32xf32> to vector<8x16x32xf32>
    %121 = arith.mulf %116, %120 : vector<8x16x32xf32>
    %122 = arith.addf %114, %121 : vector<8x16x32xf32>
    %c0_79 = arith.constant 0 : index
    %c8_80 = arith.constant 8 : index
    %c2_81 = arith.constant 2 : index
    %c0_82 = arith.constant 0 : index
    %123 = vector.load %arg7[%c0_79, %c8_80, %c2_81, %c0_82] : memref<1x18x18x32xf32, #tpu.memory_space<vmem>>, vector<1x8x16x32xf32>
    %124 = vector.shape_cast %123 : vector<1x8x16x32xf32> to vector<8x16x32xf32>
    %125 = vector.extract_strided_slice %21 {offsets = [0, 2, 0], sizes = [1, 1, 32], strides = [1, 1, 1]} : vector<3x3x32xf32> to vector<1x1x32xf32>
    %126 = vector.shape_cast %125 : vector<1x1x32xf32> to vector<32xf32>
    %127 = vector.shape_cast %126 : vector<32xf32> to vector<1x1x32xf32>
    %128 = vector.broadcast %127 : vector<1x1x32xf32> to vector<8x16x32xf32>
    %129 = arith.mulf %124, %128 : vector<8x16x32xf32>
    %130 = arith.addf %122, %129 : vector<8x16x32xf32>
    %c0_83 = arith.constant 0 : index
    %c9 = arith.constant 9 : index
    %c0_84 = arith.constant 0 : index
    %c0_85 = arith.constant 0 : index
    %131 = vector.load %arg7[%c0_83, %c9, %c0_84, %c0_85] : memref<1x18x18x32xf32, #tpu.memory_space<vmem>>, vector<1x8x16x32xf32>
    %132 = vector.shape_cast %131 : vector<1x8x16x32xf32> to vector<8x16x32xf32>
    %133 = vector.extract_strided_slice %21 {offsets = [1, 0, 0], sizes = [1, 1, 32], strides = [1, 1, 1]} : vector<3x3x32xf32> to vector<1x1x32xf32>
    %134 = vector.shape_cast %133 : vector<1x1x32xf32> to vector<32xf32>
    %135 = vector.shape_cast %134 : vector<32xf32> to vector<1x1x32xf32>
    %136 = vector.broadcast %135 : vector<1x1x32xf32> to vector<8x16x32xf32>
    %137 = arith.mulf %132, %136 : vector<8x16x32xf32>
    %138 = arith.addf %130, %137 : vector<8x16x32xf32>
    %c0_86 = arith.constant 0 : index
    %c9_87 = arith.constant 9 : index
    %c1_88 = arith.constant 1 : index
    %c0_89 = arith.constant 0 : index
    %139 = vector.load %arg7[%c0_86, %c9_87, %c1_88, %c0_89] : memref<1x18x18x32xf32, #tpu.memory_space<vmem>>, vector<1x8x16x32xf32>
    %140 = vector.shape_cast %139 : vector<1x8x16x32xf32> to vector<8x16x32xf32>
    %141 = vector.extract_strided_slice %21 {offsets = [1, 1, 0], sizes = [1, 1, 32], strides = [1, 1, 1]} : vector<3x3x32xf32> to vector<1x1x32xf32>
    %142 = vector.shape_cast %141 : vector<1x1x32xf32> to vector<32xf32>
    %143 = vector.shape_cast %142 : vector<32xf32> to vector<1x1x32xf32>
    %144 = vector.broadcast %143 : vector<1x1x32xf32> to vector<8x16x32xf32>
    %145 = arith.mulf %140, %144 : vector<8x16x32xf32>
    %146 = arith.addf %138, %145 : vector<8x16x32xf32>
    %c0_90 = arith.constant 0 : index
    %c9_91 = arith.constant 9 : index
    %c2_92 = arith.constant 2 : index
    %c0_93 = arith.constant 0 : index
    %147 = vector.load %arg7[%c0_90, %c9_91, %c2_92, %c0_93] : memref<1x18x18x32xf32, #tpu.memory_space<vmem>>, vector<1x8x16x32xf32>
    %148 = vector.shape_cast %147 : vector<1x8x16x32xf32> to vector<8x16x32xf32>
    %149 = vector.extract_strided_slice %21 {offsets = [1, 2, 0], sizes = [1, 1, 32], strides = [1, 1, 1]} : vector<3x3x32xf32> to vector<1x1x32xf32>
    %150 = vector.shape_cast %149 : vector<1x1x32xf32> to vector<32xf32>
    %151 = vector.shape_cast %150 : vector<32xf32> to vector<1x1x32xf32>
    %152 = vector.broadcast %151 : vector<1x1x32xf32> to vector<8x16x32xf32>
    %153 = arith.mulf %148, %152 : vector<8x16x32xf32>
    %154 = arith.addf %146, %153 : vector<8x16x32xf32>
    %c0_94 = arith.constant 0 : index
    %c10 = arith.constant 10 : index
    %c0_95 = arith.constant 0 : index
    %c0_96 = arith.constant 0 : index
    %155 = vector.load %arg7[%c0_94, %c10, %c0_95, %c0_96] : memref<1x18x18x32xf32, #tpu.memory_space<vmem>>, vector<1x8x16x32xf32>
    %156 = vector.shape_cast %155 : vector<1x8x16x32xf32> to vector<8x16x32xf32>
    %157 = vector.extract_strided_slice %21 {offsets = [2, 0, 0], sizes = [1, 1, 32], strides = [1, 1, 1]} : vector<3x3x32xf32> to vector<1x1x32xf32>
    %158 = vector.shape_cast %157 : vector<1x1x32xf32> to vector<32xf32>
    %159 = vector.shape_cast %158 : vector<32xf32> to vector<1x1x32xf32>
    %160 = vector.broadcast %159 : vector<1x1x32xf32> to vector<8x16x32xf32>
    %161 = arith.mulf %156, %160 : vector<8x16x32xf32>
    %162 = arith.addf %154, %161 : vector<8x16x32xf32>
    %c0_97 = arith.constant 0 : index
    %c10_98 = arith.constant 10 : index
    %c1_99 = arith.constant 1 : index
    %c0_100 = arith.constant 0 : index
    %163 = vector.load %arg7[%c0_97, %c10_98, %c1_99, %c0_100] : memref<1x18x18x32xf32, #tpu.memory_space<vmem>>, vector<1x8x16x32xf32>
    %164 = vector.shape_cast %163 : vector<1x8x16x32xf32> to vector<8x16x32xf32>
    %165 = vector.extract_strided_slice %21 {offsets = [2, 1, 0], sizes = [1, 1, 32], strides = [1, 1, 1]} : vector<3x3x32xf32> to vector<1x1x32xf32>
    %166 = vector.shape_cast %165 : vector<1x1x32xf32> to vector<32xf32>
    %167 = vector.shape_cast %166 : vector<32xf32> to vector<1x1x32xf32>
    %168 = vector.broadcast %167 : vector<1x1x32xf32> to vector<8x16x32xf32>
    %169 = arith.mulf %164, %168 : vector<8x16x32xf32>
    %170 = arith.addf %162, %169 : vector<8x16x32xf32>
    %c0_101 = arith.constant 0 : index
    %c10_102 = arith.constant 10 : index
    %c2_103 = arith.constant 2 : index
    %c0_104 = arith.constant 0 : index
    %171 = vector.load %arg7[%c0_101, %c10_102, %c2_103, %c0_104] : memref<1x18x18x32xf32, #tpu.memory_space<vmem>>, vector<1x8x16x32xf32>
    %172 = vector.shape_cast %171 : vector<1x8x16x32xf32> to vector<8x16x32xf32>
    %173 = vector.extract_strided_slice %21 {offsets = [2, 2, 0], sizes = [1, 1, 32], strides = [1, 1, 1]} : vector<3x3x32xf32> to vector<1x1x32xf32>
    %174 = vector.shape_cast %173 : vector<1x1x32xf32> to vector<32xf32>
    %175 = vector.shape_cast %174 : vector<32xf32> to vector<1x1x32xf32>
    %176 = vector.broadcast %175 : vector<1x1x32xf32> to vector<8x16x32xf32>
    %177 = arith.mulf %172, %176 : vector<8x16x32xf32>
    %178 = arith.addf %170, %177 : vector<8x16x32xf32>
    %179 = vector.broadcast %24 : vector<1x1x32xf32> to vector<8x16x32xf32>
    %180 = arith.mulf %178, %179 : vector<8x16x32xf32>
    %181 = vector.broadcast %27 : vector<1x1x32xf32> to vector<8x16x32xf32>
    %182 = arith.addf %180, %181 : vector<8x16x32xf32>
    %cst_105 = arith.constant 0.000000e+00 : f32
    %183 = vector.broadcast %cst_105 : f32 to vector<8x16x32xf32>
    %184 = arith.maximumf %182, %183 : vector<8x16x32xf32>
    %c0_106 = arith.constant 0 : index
    %c8_107 = arith.constant 8 : index
    %c0_108 = arith.constant 0 : index
    %c0_109 = arith.constant 0 : index
    %185 = vector.load %arg6[%c0_106, %c8_107, %c0_108, %c0_109] : memref<1x16x16x32xf32, #tpu.memory_space<vmem>>, vector<1x8x16x32xf32>
    %186 = vector.shape_cast %185 : vector<1x8x16x32xf32> to vector<8x16x32xf32>
    %187 = vector.shape_cast %184 : vector<8x16x32xf32> to vector<1x8x16x32xf32>
    tpu.vector_store %arg6[%c0_106, %c8_107, %c0_108, %c0_109], %187 {strides = array<i32>} : memref<1x16x16x32xf32, #tpu.memory_space<vmem>>, vector<1x8x16x32xf32>,
    return
  }
  func.func @transform_0(%arg0: i32, %arg1: i32) -> (i32, i32, i32, i32, i32) {
    %c0_i32 = arith.constant 0 : i32
    %c0_i32_0 = arith.constant 0 : i32
    %c0_i32_1 = arith.constant 0 : i32
    %c0_i32_2 = arith.constant 0 : i32
    return %arg0, %c0_i32, %c0_i32_0, %c0_i32_1, %arg1 : i32, i32, i32, i32, i32
  }
  func.func @transform_1(%arg0: i32, %arg1: i32) -> (i32, i32, i32) {
    %c0_i32 = arith.constant 0 : i32
    %c0_i32_0 = arith.constant 0 : i32
    %c0_i32_1 = arith.constant 0 : i32
    return %c0_i32, %c0_i32_0, %arg1 : i32, i32, i32
  }
  func.func @transform_2(%arg0: i32, %arg1: i32) -> (i32, i32) {
    %c0_i32 = arith.constant 0 : i32
    %c0_i32_0 = arith.constant 0 : i32
    return %c0_i32, %arg1 : i32, i32
  }
  func.func @transform_3(%arg0: i32, %arg1: i32) -> (i32, i32) {
    %c0_i32 = arith.constant 0 : i32
    %c0_i32_0 = arith.constant 0 : i32
    return %c0_i32, %arg1 : i32, i32
  }
  func.func @transform_4(%arg0: i32, %arg1: i32) -> (i32, i32, i32, i32) {
    %c0_i32 = arith.constant 0 : i32
    %c0_i32_0 = arith.constant 0 : i32
    %c0_i32_1 = arith.constant 0 : i32
    return %arg0, %c0_i32, %c0_i32_0, %arg1 : i32, i32, i32, i32
  }
}

</mosaic_0001>

<bundles_post_ra>
// kernel: tpu_custom_call.1
= control target key start
LH: loop header
LB: loop body
LE: loop exit
PB: predicated region body
PF: predicated region fallthrough
CT: control target
= control target key end

     0   :  { %9 = vsyncpa [#allocation4], 0  ;;  %s3046_s0 = inlined_call_operand.hbm [shape: f32[2,1,16,16,32], index: 0, kind: input, shape index: {}]   ;;  %s3047_s1 = inlined_call_operand.hbm [shape: f32[3,3,32], index: 1, kind: input, shape index: {}]   ;;  %s3048_s2 = inlined_call_operand.vmem [shape: f32[1,32], index: 2, kind: input, shape index: {}]   ;;  %s3049_s3 = inlined_call_operand.vmem [shape: f32[1,32], index: 3, kind: input, shape index: {}]   ;;  %s3050_s4 = inlined_call_operand.hbm [shape: f32[2,16,16,32], index: 4, kind: output, shape index: {}]  }
   0x1   :  { %11 = vsyncpa [#allocation4 + $0x1], 0 }
   0x2   :  { %12 = vsyncpa [#allocation7], 0 }
   0x3   :  { %13 = vsyncpa [#allocation5], 0 }
   0x4   :  { %15 = vsyncpa [#allocation5 + $0x1], 0  ;;  %s1850_s15 = smov 0   ;;  %s1852_s16 = smov 0  }
   0x5   :  { %s1854_s17 = smov 0   ;;  %s1856_s18 = smov 0  }
   0x6   :  { %s1858_s19 = smov 0   ;;  %s1860_s20 = smov 0  }
   0x7 LB: > { %s1548_s21 = sadd.s32 4294967295, %s1813_s20   ;;  %s1549_s22 = sadd.s32 4294967294, %s1813_s20   ;;  %s1813_s20 = sphi %s1860_s20, %s21_s20   ;;  %s1809_s19 = sphi %s1858_s19, %s3074_s19   ;;  %s1805_s18 = sphi %s1856_s18, %s3073_s18   ;;  %s1801_s17 = sphi %s1854_s17, %s3072_s17   ;;  %s1797_s16 = sphi %s1852_s16, %s3071_s16   ;;  %s1793_s15 = sphi %s1850_s15, %s3070_s15  }
   0x8   : > { %p55_p0 = scmp.ne.s32.totalorder %s1797_s16, %s1793_s15  ;;  %p1884_p1 = scmp.eq.s32.totalorder %s1548_s21, 0 }
   0x9   : > { %p1888_p2 = scmp.eq.s32.totalorder %s1548_s21, 1  ;;  %p165_p3 = scmp.eq.s32.totalorder %s1549_s22, 1 }
   0xa   : > { %s3055_s23 = scalar_select %p1884_p1, 1, 0 }
   0xb   : > { %s3056_s24 = scalar_select %p1888_p2, 1, 0 }
   0xc   : > { %p1894_p4 = por %p1884_p1, %p55_p0  ;;  %p1550_p5 = scmp.ge.s32.totalorder %s1813_s20, 1 }
   0xd   : > { %p1899_p6 = por %p165_p3, %p55_p0  ;;  %p172_p7 = scmp.lt.s32.totalorder %s1813_s20, 3 }
   0xe   : > { %s3057_s25 = scalar_select %p1894_p4, 1, 0 }
   0xf   : > { %s3058_s26 = scalar_select %p1899_p6, 1, 0 }
  0x10   : > { %p1904_p8 = pnand %p1550_p5, %p172_p7  ;;  %s1815_s28 = smov [#allocation6]  }
  0x11   : > { %s186_s29 = sshll.u32 %s1815_s28, 4  ;;  %s33_s5 = sadd.s32 1, %s1809_s19  ;;  %s187_s29 = int_to_ptr.vmem [resolvable:$true] %s186_s29 }
  0x12   : > { %s3059_s27 = scalar_select %p1904_p8, 1, 0 }
  0x13   : > { %p1595_p9 = pneg %p1904_p8  ;;  %s1669_s8 = scalar_lea.hbm %s3047_s1, 192 }
  0x14   : > { %p1670_p12 = scmp.ne.s32.totalorder %s3047_s1, %s1669_s8  ;;  %p1676_p5 = scmp.lt.u32.totalorder %s1669_s8, %s3047_s1 }
  0x15   : > { %p1913_p11 = pnand %p1595_p9, %p1884_p1 }
  0x17   : > { %p1671_p13 = pneg %p1913_p11 }
  0x19   : > { %p1672_p0 = pnand %p1671_p13, %p1670_p12 }
  0x1b   : > { %p1673_p3 = pneg %p1672_p0 }
  0x1d   : > { %p1678_p7 = pnand %p1676_p5, %p1673_p3 }
  0x1f   : > { %1681 = shalt.err (!%p1678_p7)
}
  0x20   : > { %s1682_s13 = scalar_lea.vmem %s187_s29, 192  ;;  %p1690_p1 = scmp.lt.s32.totalorder %s187_s29, %s187_s29 }
  0x21   : > { %p1683_p9 = scmp.ne.s32.totalorder %s187_s29, %s1682_s13  ;;  %p1691_p4 = scmp.lt.s32.totalorder %s1682_s13, %s1682_s13 }
  0x23   : > { %p1685_p10 = pnand %p1683_p9, %p1671_p13  ;;  %p1692_p8 = por %p1691_p4, %p1690_p1 }
  0x25   : > { %p1686_p6 = pneg %p1685_p10 }
  0x27   : > { %p1693_p2 = pnand %p1692_p8, %p1686_p6 }
  0x29   : > { %1696 = shalt.err (!%p1693_p2)
}
  0x2a   : > { %s1816_s14 = smov 64   ;;  %s1817_s21 = smov 4  }
  0x2b   : > { %1598 = dma.hbm_to_vmem [thread:$0]  (!%p1913_p11), %s3047_s1, 192, %s187_s29, [#allocation7], %s1816_s14, %s1816_s14, %s1817_s21  }
  0x2c   : > { %p35_p1 = scmp.ge.s32.totalorder %s33_s5, 2  ;;  %s42_s6 = sadd.s32 1, %s1801_s17 }
  0x2d   : > { %p49_p2 = scmp.ne.s32.totalorder %s1801_s17, %s1797_s16  ;;  %p50_p4 = scmp.eq.s32.totalorder %s1813_s20, 0 }
  0x2e   : > { %s3076_s5 = smov (%p35_p1, %s33_s5), 0  ;;  %p3062_p8 = scmp.ne.s32.totalorder %s3056_s24, 0 }
  0x2f   : > { %p1940_p6 = por %p50_p4, %p49_p2  ;;  %s37_s30 = ssub.s32 %s1809_s19, %s3076_s5 }
  0x30   : > { %p1946_p10 = por %p3062_p8, %p49_p2  ;;  %p1608_p12 = scmp.lt.s32.totalorder %s1813_s20, 2 }
  0x31   : > { %p40_p11 = scmp.eq.s32.totalorder %s37_s30, 0  ;;  %s212_s29 = sand.u32 1, %s1801_s17  }
  0x32   : > { %s1555_s9 = sshll.u32 %s212_s29, 8  ;;  %s1585_s11 = sshll.u32 %s1809_s19, 12 }
  0x33   : > { %s1955_s10 = scalar_select %p40_p11, %s1801_s17, %s42_s6  }
  0x34   : > { %s1961_s14 = scalar_lea.hbm %s3046_s0, %s1585_s11  ;;  %s216_s24 = scalar_lea.vmem [#allocation3], %s1555_s9 }
  0x35   : > { %s224_s21 = sshll.u32 %s216_s24, 4  ;;  %p1967_p13 = pnand %p1608_p12, %p1940_p6  ;;  %s1963_s21 = int_to_ptr.vmem [resolvable:$true] %s224_s21 }
  0x36   : > { %s1971_s28 = scalar_lea.sflag [#allocation4], %s212_s29  ;;  %s1697_s6 = scalar_lea.hbm %s1961_s14, 4096 }
  0x37   : > { %p1698_p0 = scmp.ne.s32.totalorder %s1961_s14, %s1697_s6  ;;  %p1699_p3 = pneg %p1967_p13 }
  0x38   : > { %s1702_s7 = scalar_lea.hbm %s3046_s0, 8192  ;;  %p1703_p9 = scmp.lt.u32.totalorder %s1961_s14, %s3046_s0 }
  0x39   : > { %p1700_p5 = pnand %p1699_p3, %p1698_p0  ;;  %p1704_p1 = scmp.lt.u32.totalorder %s1702_s7, %s1697_s6 }
  0x3a   : > { %p1706_p4 = scmp.lt.u32.totalorder %s1697_s6, %s1961_s14 }
  0x3b   : > { %p1701_p7 = pneg %p1700_p5  ;;  %p1705_p2 = por %p1704_p1, %p1703_p9 }
  0x3d   : > { %p1707_p6 = por %p1706_p4, %p1705_p2 }
  0x3f   : > { %p1708_p8 = pnand %p1707_p6, %p1701_p7 }
  0x41   : > { %1711 = shalt.err (!%p1708_p8)
}
  0x42   : > { %s1712_s29 = scalar_lea.vmem %s1963_s21, 4096  ;;  %s1818_s13 = smov [#allocation3]  }
  0x43   : > { %p1713_p12 = scmp.ne.s32.totalorder %s1963_s21, %s1712_s29  ;;  %s1717_s24 = sshll.u32 %s1818_s13, 4  ;;  %s1718_s24 = int_to_ptr.vmem [resolvable:$false] %s1717_s24 }
  0x44   : > { %s1719_s30 = scalar_lea.vmem %s1718_s24, 8192  ;;  %p1720_p5 = scmp.lt.s32.totalorder %s1963_s21, %s1718_s24 }
  0x45   : > { %p1715_p11 = pnand %p1713_p12, %p1699_p3  ;;  %p1721_p9 = scmp.lt.s32.totalorder %s1719_s30, %s1712_s29 }
  0x47   : > { %p1716_p0 = pneg %p1715_p11  ;;  %p1722_p1 = por %p1721_p9, %p1720_p5 }
  0x49   : > { %p1723_p2 = pnand %p1722_p1, %p1716_p0 }
  0x4b   : > { %1726 = shalt.err (!%p1723_p2)
}
  0x4c   : > { %s1819_s6 = smov 128   ;;  %s1820_s9 = smov 8  }
  0x4d   : > { %1602 = dma.hbm_to_vmem [thread:$0]  (!%p1967_p13), %s1961_s14, 4096, %s1963_s21, %s1971_s28, %s1819_s6, %s1819_s6, %s1820_s9  }
  0x4e   : > { %p3065_p3 = scmp.ne.s32.totalorder %s3059_s27, 0 }
  0x4f   : > { %s2002_s7 = sand.u32 (!%p3065_p3), 1, %s1797_s16   ;;  %p3066_p7 = scmp.ne.s32.totalorder (!%p3065_p3), %s3057_s25, 0 }
  0x50   : > { %236 = sbr.rel (%p3065_p3) target bundleno = 308 (0x134), region = 36  ;;  %s1559_s11 = sshll.u32 (!%p3065_p3), %s2002_s7, 8 }
  0x51   : > { %s239_s12 = scalar_lea.sflag (!%p3065_p3), [#allocation4], %s2002_s7  ;;  %s2008_s29 = scalar_lea.vmem (!%p3065_p3), [#allocation3], %s1559_s11 }
  0x57   : > { %1780 = dma.done.wait (%p3066_p7), %s239_s12, 4096  }
  0x58   : > { %1782 = vsyncadd (%p3066_p7), %s239_s12, 4294963200  ;;  %p3067_p13 = scmp.ne.s32.totalorder %s3055_s23, 0 }
  0x5a   : > { %1784 = dma.done.wait (%p3067_p13), [#allocation7], 192  }
  0x5b   : > { %1786 = vsyncadd (%p3067_p13), [#allocation7], 4294967104  ;;  %vm283_vm0 = vcmask 261120   ;;  %vm286_vm1 = vcmask 254976   ;;  %vm292_vm2 = vcmask 253952   ;;  %v1821_v0 = vmov 0.0  }
  0x5c   : > { %284 = vst.msk [vmem:[#allocation2] sm:$0xff] %vm283_vm0, %v1821_v0  ;;  %285 = vst.msk [vmem:[#allocation2 + $0x8] sm:$0xff] %vm283_vm0, %v1821_v0  ;;  %v415_v1 = vlaneseq  ;;  %v329_v2 = vld [vmem:[%s2008_s29] sm:$0xff]  ;;  %v330_v3 = vld [vmem:[%s2008_s29 + $0x8] sm:$0xff]  ;;  %s2259_s21 = scalar_lea.vmem [#allocation8], %s1559_s11  ;;  %s1586_s30 = sshll.u32 %s1805_s18, 12 }
  0x5d   : > { %289 = vst.msk [vmem:[#allocation2 + $0x198] sm:$0xff] %vm283_vm0, %v1821_v0  ;;  %290 = vst.msk [vmem:[#allocation2 + $0x1a0] sm:$0xff] %vm283_vm0, %v1821_v0  ;;  %v331_v4 = vld [vmem:[%s2008_s29 + $0x10] sm:$0xff]  ;;  %v332_v5 = vld [vmem:[%s2008_s29 + $0x18] sm:$0xff]  ;;  %s1427_s6 = sshll.u32 %s2259_s21, 4  ;;  %s2993_s12 = scalar_lea.hbm %s3050_s4, %s1586_s30  ;;  %s2995_s6 = int_to_ptr.vmem [resolvable:$true] %s1427_s6 }
  0x5e   : > { %287 = vst.msk [vmem:[#allocation2 + $0x10] sm:$0x3] %vm286_vm1, %v1821_v0  ;;  %291 = vst.msk [vmem:[#allocation2 + $0x1a8] sm:$0x3] %vm286_vm1, %v1821_v0  ;;  %v333_v6 = vld [vmem:[%s2008_s29 + $0x20] sm:$0xff]  ;;  %v334_v7 = vld [vmem:[%s2008_s29 + $0x28] sm:$0xff] }
  0x5f   : > { %294 = vst.msk [vmem:[#allocation2 + $0x18] sm:$0x1] %vm292_vm2, %v1821_v0  ;;  %295 = vst.msk [vmem:[#allocation2 + $0x30] sm:$0x1] %vm292_vm2, %v1821_v0  ;;  %v335_v8 = vld [vmem:[%s2008_s29 + $0x30] sm:$0xff]  ;;  %v336_v9 = vld [vmem:[%s2008_s29 + $0x38] sm:$0xff] }
  0x60   : > { %296 = vst.msk [vmem:[#allocation2 + $0x48] sm:$0x1] %vm292_vm2, %v1821_v0  ;;  %297 = vst.msk [vmem:[#allocation2 + $0x60] sm:$0x1] %vm292_vm2, %v1821_v0  ;;  %v337_v10 = vld [vmem:[%s2008_s29 + $0x40] sm:$0xff]  ;;  %v338_v11 = vld [vmem:[%s2008_s29 + $0x48] sm:$0xff] }
  0x61   : > { %298 = vst.msk [vmem:[#allocation2 + $0x78] sm:$0x1] %vm292_vm2, %v1821_v0  ;;  %299 = vst.msk [vmem:[#allocation2 + $0x90] sm:$0x1] %vm292_vm2, %v1821_v0  ;;  %v339_v12 = vld [vmem:[%s2008_s29 + $0x50] sm:$0xff]  ;;  %v340_v13 = vld [vmem:[%s2008_s29 + $0x58] sm:$0xff] }
  0x62   : > { %300 = vst.msk [vmem:[#allocation2 + $0xa8] sm:$0x1] %vm292_vm2, %v1821_v0  ;;  %301 = vst.msk [vmem:[#allocation2 + $0xc0] sm:$0x1] %vm292_vm2, %v1821_v0  ;;  %v416_v14 = vshrl.u32 %v415_v1, 7  ;;  %v341_v15 = vld [vmem:[%s2008_s29 + $0x60] sm:$0xff] }
  0x63   : > { %302 = vst.msk [vmem:[#allocation2 + $0xd8] sm:$0x1] %vm292_vm2, %v1821_v0  ;;  %303 = vst.msk [vmem:[#allocation2 + $0xf0] sm:$0x1] %vm292_vm2, %v1821_v0  ;;  %v342_v16 = vld [vmem:[%s2008_s29 + $0x68] sm:$0xff]  ;;  %v343_v17 = vld [vmem:[%s2008_s29 + $0x70] sm:$0xff] }
  0x64   : > { %304 = vst.msk [vmem:[#allocation2 + $0x108] sm:$0x1] %vm292_vm2, %v1821_v0  ;;  %305 = vst.msk [vmem:[#allocation2 + $0x120] sm:$0x1] %vm292_vm2, %v1821_v0  ;;  %v344_v18 = vld [vmem:[%s2008_s29 + $0x78] sm:$0xff]  ;;  %v345_v19 = vld [vmem:[%s2008_s29 + $0x80] sm:$0xff] }
  0x65   : > { %306 = vst.msk [vmem:[#allocation2 + $0x138] sm:$0x1] %vm292_vm2, %v1821_v0  ;;  %307 = vst.msk [vmem:[#allocation2 + $0x150] sm:$0x1] %vm292_vm2, %v1821_v0  ;;  %v346_v20 = vld [vmem:[%s2008_s29 + $0x88] sm:$0xff]  ;;  %v347_v21 = vld [vmem:[%s2008_s29 + $0x90] sm:$0xff] }
  0x66   : > { %308 = vst.msk [vmem:[#allocation2 + $0x168] sm:$0x1] %vm292_vm2, %v1821_v0  ;;  %309 = vst.msk [vmem:[#allocation2 + $0x180] sm:$0x1] %vm292_vm2, %v1821_v0  ;;  %v348_v22 = vld [vmem:[%s2008_s29 + $0x98] sm:$0xff]  ;;  %v349_v23 = vld [vmem:[%s2008_s29 + $0xa0] sm:$0xff] }
  0x67   : > { %312 = vst.msk [vmem:[#allocation2 + $0x29] sm:$0x1] %vm292_vm2, %v1821_v0  ;;  %313 = vst.msk [vmem:[#allocation2 + $0x41] sm:$0x1] %vm292_vm2, %v1821_v0  ;;  %v350_v24 = vld [vmem:[%s2008_s29 + $0xa8] sm:$0xff]  ;;  %v351_v25 = vld [vmem:[%s2008_s29 + $0xb0] sm:$0xff] }
  0x68   : > { %314 = vst.msk [vmem:[#allocation2 + $0x59] sm:$0x1] %vm292_vm2, %v1821_v0  ;;  %315 = vst.msk [vmem:[#allocation2 + $0x71] sm:$0x1] %vm292_vm2, %v1821_v0  ;;  %v352_v26 = vld [vmem:[%s2008_s29 + $0xb8] sm:$0xff]  ;;  %v417_v27 = vsub.s32 0, %v416_v14 }
  0x69   : > { %316 = vst.msk [vmem:[#allocation2 + $0x89] sm:$0x1] %vm292_vm2, %v1821_v0  ;;  %317 = vst.msk [vmem:[#allocation2 + $0xa1] sm:$0x1] %vm292_vm2, %v1821_v0  ;;  %v453_v28 = vsub.s32 1, %v416_v14  ;;  %v505_v29 = vsub.s32 2, %v416_v14 }
  0x6a   : > { %318 = vst.msk [vmem:[#allocation2 + $0xb9] sm:$0x1] %vm292_vm2, %v1821_v0  ;;  %319 = vst.msk [vmem:[#allocation2 + $0xd1] sm:$0x1] %vm292_vm2, %v1821_v0  ;;  %v353_v30 = vld [vmem:[%s2008_s29 + $0xc0] sm:$0xff]  ;;  %v354_v31 = vld [vmem:[%s2008_s29 + $0xc8] sm:$0xff] }
  0x6b   : > { %320 = vst.msk [vmem:[#allocation2 + $0xe9] sm:$0x1] %vm292_vm2, %v1821_v0  ;;  %321 = vst.msk [vmem:[#allocation2 + $0x101] sm:$0x1] %vm292_vm2, %v1821_v0  ;;  %v355_v32 = vld [vmem:[%s2008_s29 + $0xd0] sm:$0xff]  ;;  %v356_v33 = vld [vmem:[%s2008_s29 + $0xd8] sm:$0xff] }
  0x6c   : > { %322 = vst.msk [vmem:[#allocation2 + $0x119] sm:$0x1] %vm292_vm2, %v1821_v0  ;;  %323 = vst.msk [vmem:[#allocation2 + $0x131] sm:$0x1] %vm292_vm2, %v1821_v0  ;;  %v357_v34 = vld [vmem:[%s2008_s29 + $0xe0] sm:$0xff]  ;;  %v358_v35 = vld [vmem:[%s2008_s29 + $0xe8] sm:$0xff] }
  0x6d   : > { %324 = vst.msk [vmem:[#allocation2 + $0x149] sm:$0x1] %vm292_vm2, %v1821_v0  ;;  %325 = vst.msk [vmem:[#allocation2 + $0x161] sm:$0x1] %vm292_vm2, %v1821_v0  ;;  %v359_v36 = vld [vmem:[%s2008_s29 + $0xf0] sm:$0xff]  ;;  %v360_v37 = vld [vmem:[%s2008_s29 + $0xf8] sm:$0xff] }
  0x6e   : > { %326 = vst.msk [vmem:[#allocation2 + $0x179] sm:$0x1] %vm292_vm2, %v1821_v0  ;;  %327 = vst.msk [vmem:[#allocation2 + $0x191] sm:$0x1] %vm292_vm2, %v1821_v0  ;;  %v394_v38 = vld [vmem:[#allocation6] sm:$0x7] }
  0x6f   : > { %293 = vst.msk [vmem:[#allocation2] sm:$0x1] %vm292_vm2, %v1821_v0  ;;  %310 = vst.msk [vmem:[#allocation2 + $0x198] sm:$0x1] %vm292_vm2, %v1821_v0  ;;  %v395_v39 = vld [vmem:[#allocation6 + $0x4] sm:$0x7]  ;;  %v2122_v41 = vrot.slane %v394_v38, %v417_v27  ;;  %v2124_v42 = vrot.slane %v394_v38, %v453_v28  ;;  %v2126_v43 = vrot.slane %v394_v38, %v505_v29 }
  0x70   : > { %311 = vst.msk [vmem:[#allocation2 + $0x11] sm:$0x1] %vm292_vm2, %v1821_v0  ;;  %328 = vst.msk [vmem:[#allocation2 + $0x1a9] sm:$0x1] %vm292_vm2, %v1821_v0  ;;  %v396_v40 = vld [vmem:[#allocation6 + $0x8] sm:$0x7]  ;;  %v2128_v46 = vrot.slane %v395_v39, %v417_v27  ;;  %v2132_v52 = vrot.slane %v395_v39, %v453_v28  ;;  %v2134_v53 = vrot.slane %v395_v39, %v505_v29 }
  0x71   : > { %362 = vst.msk [vmem:[#allocation2 + $0x19] sm:$0xff] %vm283_vm0, %v329_v2  ;;  %363 = vst.msk [vmem:[#allocation2 + $0x21] sm:$0xff] %vm283_vm0, %v330_v3  ;;  %v435_v45 = vld [vmem:[#allocation2 + $0x1] sm:$0xff]  ;;  %v2139_v57 = vrot.slane %v396_v40, %v417_v27  ;;  %v2141_v58 = vrot.slane %v396_v40, %v453_v28  ;;  %v2146_v62 = vrot.slane %v396_v40, %v505_v29  ;;  %v436_v0 = vld [vmem:[#allocation2 + $0x9] sm:$0xff]  ;;  %s1413_s29 = scalar_lea.sflag [#allocation5], %s2002_s7  ;;  %s1727_s18 = scalar_lea.vmem %s2995_s6, 4096 }
  0x72   : > { %364 = vst.msk [vmem:[#allocation2 + $0x31] sm:$0xff] %vm283_vm0, %v331_v4  ;;  %365 = vst.msk [vmem:[#allocation2 + $0x39] sm:$0xff] %vm283_vm0, %v332_v5  ;;  %v455_v48 = vmul.f32 %v2124_v42, %v435_v45  ;;  %v487_v49 = vld [vmem:[#allocation2 + $0x2] sm:$0xff]  ;;  %v456_v4 = vmul.f32 %v2124_v42, %v436_v0  ;;  %p1728_p4 = scmp.ne.s32.totalorder %s2995_s6, %s1727_s18  ;;  %s1822_s23 = smov [#allocation8]  }
  0x73   : > { %366 = vst.msk [vmem:[#allocation2 + $0x49] sm:$0xff] %vm283_vm0, %v333_v6  ;;  %367 = vst.msk [vmem:[#allocation2 + $0x51] sm:$0xff] %vm283_vm0, %v334_v7  ;;  %v507_v54 = vmul.f32 %v2126_v43, %v487_v49  ;;  %v400_v63 = vld [vmem:[#allocation2 + $0x8] sm:$0xff]  ;;  %s1731_s25 = sshll.u32 %s1822_s23, 4  ;;  %s1732_s25 = int_to_ptr.vmem [resolvable:$false] %s1731_s25 }
  0x74   : > { %368 = vst.msk [vmem:[#allocation2 + $0x61] sm:$0xff] %vm283_vm0, %v335_v8  ;;  %369 = vst.msk [vmem:[#allocation2 + $0x69] sm:$0xff] %vm283_vm0, %v336_v9  ;;  %v420_v3 = vmul.f32 %v2122_v41, %v400_v63  ;;  %p1729_p6 = pnand %p1728_p4, %p1946_p10  ;;  %s1733_s27 = scalar_lea.vmem %s1732_s25, 8192 }
  0x75   : > { %370 = vst.msk [vmem:[#allocation2 + $0x79] sm:$0xff] %vm283_vm0, %v337_v10  ;;  %371 = vst.msk [vmem:[#allocation2 + $0x81] sm:$0xff] %vm283_vm0, %v338_v11  ;;  %p1734_p12 = scmp.lt.s32.totalorder %s2995_s6, %s1732_s25  ;;  %p1735_p11 = scmp.lt.s32.totalorder %s1733_s27, %s1727_s18 }
  0x76   : > { %372 = vst.msk [vmem:[#allocation2 + $0x91] sm:$0xff] %vm283_vm0, %v339_v12  ;;  %373 = vst.msk [vmem:[#allocation2 + $0x99] sm:$0xff] %vm283_vm0, %v340_v13  ;;  %v399_v44 = vld [vmem:[#allocation2] sm:$0xff]  ;;  %p1730_p8 = pneg %p1729_p6 }
  0x77   : > { %374 = vst.msk [vmem:[#allocation2 + $0xa9] sm:$0xff] %vm283_vm0, %v341_v15  ;;  %375 = vst.msk [vmem:[#allocation2 + $0xb1] sm:$0xff] %vm283_vm0, %v342_v16  ;;  %v419_v47 = vmul.f32 %v2122_v41, %v399_v44  ;;  %v488_v5 = vld [vmem:[#allocation2 + $0xa] sm:$0xff]  ;;  %p1736_p0 = por %p1735_p11, %p1734_p12 }
  0x78   : > { %376 = vst.msk [vmem:[#allocation2 + $0xc1] sm:$0xff] %vm283_vm0, %v343_v17  ;;  %377 = vst.msk [vmem:[#allocation2 + $0xc9] sm:$0xff] %vm283_vm0, %v344_v18  ;;  %v539_v50 = vld [vmem:[#allocation2 + $0x18] sm:$0xff]  ;;  %v540_v6 = vld [vmem:[#allocation2 + $0x20] sm:$0xff]  ;;  %v508_v11 = vmul.f32 %v2126_v43, %v488_v5  ;;  %v472_v17 = vadd.f32 %v456_v4, %v420_v3 }
  0x79   : > { %378 = vst.msk [vmem:[#allocation2 + $0xd9] sm:$0xff] %vm283_vm0, %v345_v19  ;;  %379 = vst.msk [vmem:[#allocation2 + $0xe1] sm:$0xff] %vm283_vm0, %v346_v20  ;;  %v591_v51 = vld [vmem:[#allocation2 + $0x19] sm:$0xff]  ;;  %v2137_v56 = vld [vmem:[#allocation2 + $0x30] sm:$0xff]  ;;  %v471_v59 = vadd.f32 %v455_v48, %v419_v47  ;;  %v559_v60 = vmul.f32 %v2128_v46, %v539_v50  ;;  %v421_v1 = vmul.f32 %v539_v50, %v2122_v41  ;;  %p1737_p5 = pnand %p1736_p0, %p1730_p8 }
  0x7a   : > { %380 = vst.msk [vmem:[#allocation2 + $0xf1] sm:$0xff] %vm283_vm0, %v347_v21  ;;  %381 = vst.msk [vmem:[#allocation2 + $0xf9] sm:$0xff] %vm283_vm0, %v348_v22  ;;  %v643_v55 = vld [vmem:[#allocation2 + $0x1a] sm:$0xff]  ;;  %v2144_v61 = vld [vmem:[#allocation2 + $0x31] sm:$0xff]  ;;  %v457_v7 = vmul.f32 %v591_v51, %v2124_v42  ;;  %v611_v9 = vmul.f32 %v2132_v52, %v591_v51  ;;  %v716_v15 = vmul.f32 %v2139_v57, %v2137_v56 }
  0x7b   : > { %382 = vst.msk [vmem:[#allocation2 + $0x109] sm:$0xff] %vm283_vm0, %v349_v23  ;;  %383 = vst.msk [vmem:[#allocation2 + $0x111] sm:$0xff] %vm283_vm0, %v350_v24  ;;  %v2149_v2 = vld [vmem:[#allocation2 + $0x32] sm:$0xff]  ;;  %v523_v8 = vadd.f32 %v507_v54, %v471_v59  ;;  %v663_v10 = vmul.f32 %v2134_v53, %v643_v55  ;;  %v592_v12 = vld [vmem:[#allocation2 + $0x21] sm:$0xff]  ;;  %v768_v16 = vmul.f32 %v2141_v58, %v2144_v61 }
  0x7c   : > { %384 = vst.msk [vmem:[#allocation2 + $0x121] sm:$0xff] %vm283_vm0, %v351_v25  ;;  %385 = vst.msk [vmem:[#allocation2 + $0x129] sm:$0xff] %vm283_vm0, %v352_v26  ;;  %v644_v13 = vld [vmem:[#allocation2 + $0x22] sm:$0xff]  ;;  %v2157_v14 = vld [vmem:[#allocation2 + $0x38] sm:$0xff]  ;;  %v560_v18 = vmul.f32 %v2128_v46, %v540_v6  ;;  %v820_v21 = vmul.f32 %v2146_v62, %v2149_v2  ;;  %v473_v23 = vadd.f32 %v457_v7, %v421_v1 }
  0x7d   : > { %386 = vst.msk [vmem:[#allocation2 + $0x139] sm:$0xff] %vm283_vm0, %v353_v30  ;;  %387 = vst.msk [vmem:[#allocation2 + $0x141] sm:$0xff] %vm283_vm0, %v354_v31  ;;  %v2164_v19 = vld [vmem:[#allocation2 + $0x39] sm:$0xff]  ;;  %v575_v20 = vadd.f32 %v559_v60, %v523_v8  ;;  %v509_v24 = vmul.f32 %v643_v55, %v2126_v43  ;;  %v524_v25 = vadd.f32 %v508_v11, %v472_v17  ;;  %v2200_v63 = vld [vmem:[#allocation2 + $0x50] sm:$0xff] }
  0x7e   : > { %388 = vst.msk [vmem:[#allocation2 + $0x151] sm:$0xff] %vm283_vm0, %v355_v32  ;;  %389 = vst.msk [vmem:[#allocation2 + $0x159] sm:$0xff] %vm283_vm0, %v356_v33  ;;  %v2168_v22 = vld [vmem:[#allocation2 + $0x3a] sm:$0xff]  ;;  %v612_v26 = vmul.f32 %v2132_v52, %v592_v12  ;;  %v664_v27 = vmul.f32 %v2134_v53, %v644_v13  ;;  %v717_v28 = vmul.f32 %v2139_v57, %v2157_v14  ;;  %v2179_v33 = vld [vmem:[#allocation2 + $0x48] sm:$0xff] }
  0x7f   : > { %390 = vst.msk [vmem:[#allocation2 + $0x169] sm:$0xff] %vm283_vm0, %v357_v34  ;;  %391 = vst.msk [vmem:[#allocation2 + $0x171] sm:$0xff] %vm283_vm0, %v358_v35  ;;  %v627_v29 = vadd.f32 %v611_v9, %v575_v20  ;;  %v769_v30 = vmul.f32 %v2141_v58, %v2164_v19  ;;  %v525_v31 = vadd.f32 %v509_v24, %v473_v23  ;;  %v2208_v8 = vld [vmem:[#allocation2 + $0x51] sm:$0xff]  ;;  %v2217_v11 = vld [vmem:[%s3048_s2] ss:$0 sm:$0xff] }
  0x80   : > { %392 = vst.msk [vmem:[#allocation2 + $0x181] sm:$0xff] %vm283_vm0, %v359_v36  ;;  %393 = vst.msk [vmem:[#allocation2 + $0x189] sm:$0xff] %vm283_vm0, %v360_v37  ;;  %v561_v32 = vmul.f32 %v2137_v56, %v2128_v46  ;;  %v576_v34 = vadd.f32 %v560_v18, %v524_v25  ;;  %v821_v35 = vmul.f32 %v2146_v62, %v2168_v22  ;;  %v2183_v36 = vld [vmem:[#allocation2 + $0x49] sm:$0xff]  ;;  %v2210_v9 = vld [vmem:[#allocation2 + $0x52] sm:$0xff] }
  0x81   : > { %v2185_v37 = vld [vmem:[#allocation2 + $0x4a] sm:$0xff]  ;;  %v422_v38 = vmul.f32 %v540_v6, %v2122_v41  ;;  %v458_v39 = vmul.f32 %v592_v12, %v2124_v42  ;;  %v679_v40 = vadd.f32 %v663_v10, %v627_v29  ;;  %v613_v45 = vmul.f32 %v2144_v61, %v2132_v52 }
  0x82   : > { %v577_v44 = vadd.f32 %v561_v32, %v525_v31  ;;  %v665_v47 = vmul.f32 %v2149_v2, %v2134_v53  ;;  %v628_v48 = vadd.f32 %v612_v26, %v576_v34  ;;  %v718_v49 = vmul.f32 %v2139_v57, %v2179_v33 }
  0x83   : > { %v474_v50 = vadd.f32 %v458_v39, %v422_v38  ;;  %v510_v51 = vmul.f32 %v644_v13, %v2126_v43  ;;  %v732_v54 = vadd.f32 %v716_v15, %v679_v40  ;;  %v770_v59 = vmul.f32 %v2141_v58, %v2183_v36 }
  0x84   : > { %v629_v55 = vadd.f32 %v613_v45, %v577_v44  ;;  %v822_v60 = vmul.f32 %v2146_v62, %v2185_v37  ;;  %v680_v0 = vadd.f32 %v664_v27, %v628_v48  ;;  %v562_v3 = vmul.f32 %v2157_v14, %v2128_v46 }
  0x85   : > { %v526_v1 = vadd.f32 %v510_v51, %v474_v50  ;;  %v423_v4 = vmul.f32 %v2137_v56, %v2122_v41  ;;  %v784_v5 = vadd.f32 %v768_v16, %v732_v54  ;;  %v614_v7 = vmul.f32 %v2164_v19, %v2132_v52 }
  0x86   : > { %v681_v6 = vadd.f32 %v665_v47, %v629_v55  ;;  %v459_v10 = vmul.f32 %v2144_v61, %v2124_v42  ;;  %v733_v12 = vadd.f32 %v717_v28, %v680_v0  ;;  %v666_v56 = vmul.f32 %v2168_v22, %v2134_v53  ;;  %v2228_v61 = vld [vmem:[%s3049_s3] ss:$0 sm:$0xff] }
  0x87   : > { %v578_v13 = vadd.f32 %v562_v3, %v526_v1  ;;  %v719_v15 = vmul.f32 %v2139_v57, %v2200_v63  ;;  %v836_v16 = vadd.f32 %v820_v21, %v784_v5  ;;  %v511_v20 = vmul.f32 %v2149_v2, %v2126_v43  ;;  %v2245_v47 = vld [vmem:[#allocation2 + $0x60] sm:$0xff] }
  0x88   : > { %v734_v17 = vadd.f32 %v718_v49, %v681_v6  ;;  %v475_v18 = vadd.f32 %v459_v10, %v423_v4  ;;  %v785_v23 = vadd.f32 %v769_v30, %v733_v12  ;;  %v771_v25 = vmul.f32 %v2141_v58, %v2208_v8  ;;  %v804_v6 = vld [vmem:[#allocation2 + $0x62] sm:$0xff] }
  0x89   : > { %v630_v24 = vadd.f32 %v614_v7, %v578_v13  ;;  %v823_v26 = vmul.f32 %v2146_v62, %v2210_v9  ;;  %v858_v21 = vmul.f32 %v2217_v11, %v836_v16  ;;  %v563_v2 = vmul.f32 %v2179_v33, %v2128_v46 }
  0x8a   : > { %v786_v27 = vadd.f32 %v770_v59, %v734_v17  ;;  %v527_v28 = vadd.f32 %v511_v20, %v475_v18  ;;  %v837_v29 = vadd.f32 %v821_v35, %v785_v23  ;;  %v424_v32 = vmul.f32 %v2157_v14, %v2122_v41  ;;  %v2247_v35 = vld [vmem:[#allocation2 + $0x61] sm:$0xff] }
  0x8b   : > { %v682_v31 = vadd.f32 %v666_v56, %v630_v24  ;;  %v460_v30 = vmul.f32 %v2164_v19, %v2124_v42  ;;  %v880_v34 = vadd.f32 %v2228_v61, %v858_v21  ;;  %v615_v40 = vmul.f32 %v2183_v36, %v2132_v52  ;;  %v2270_v56 = vld [vmem:[#allocation2 + $0x68] sm:$0xff] }
  0x8c   : > { %v838_v38 = vadd.f32 %v822_v60, %v786_v27  ;;  %v579_v39 = vadd.f32 %v563_v2, %v527_v28  ;;  %v859_v44 = vmul.f32 %v2217_v11, %v837_v29  ;;  %v512_v14 = vmul.f32 %v2168_v22, %v2126_v43 }
  0x8d   : > { %v735_v45 = vadd.f32 %v719_v15, %v682_v31  ;;  %v476_v48 = vadd.f32 %v460_v30, %v424_v32  ;;  %v896_v19 = vmax.f32 %v880_v34, 0.0  ;;  %v667_v51 = vmul.f32 %v2185_v37, %v2134_v53  ;;  %v2272_v15 = vld [vmem:[#allocation2 + $0x69] sm:$0xff]  ;;  %v2297_v30 = vld [vmem:[#allocation2 + $0x78] sm:$0xff] }
  0x8e   : > { %v860_v49 = vmul.f32 %v2217_v11, %v838_v38  ;;  %v631_v50 = vadd.f32 %v615_v40, %v579_v39  ;;  %v881_v54 = vadd.f32 %v2228_v61, %v859_v44  ;;  %v564_v60 = vmul.f32 %v2200_v63, %v2128_v46  ;;  %v2303_v40 = vld [vmem:[#allocation2 + $0x79] sm:$0xff] }
  0x8f   : > { %v787_v55 = vadd.f32 %v771_v25, %v735_v45  ;;  %v528_v59 = vadd.f32 %v512_v14, %v476_v48  ;;  %912 = vst.msk [vmem:[%s2259_s21] sm:$0xff] %vm283_vm0, %v896_v19  ;;  %v720_v1 = vmul.f32 %v2139_v57, %v2245_v47  ;;  %v772_v3 = vmul.f32 %v2141_v58, %v2247_v35 }
  0x90   : > { %v882_v22 = vadd.f32 %v2228_v61, %v860_v49  ;;  %v683_v0 = vadd.f32 %v667_v51, %v631_v50  ;;  %v897_v4 = vmax.f32 %v881_v54, 0.0  ;;  %v616_v10 = vmul.f32 %v2208_v8, %v2132_v52  ;;  %v2315_v50 = vld [vmem:[#allocation2 + $0x7a] sm:$0xff] }
  0x91   : > { %v839_v5 = vadd.f32 %v823_v26, %v787_v55  ;;  %v580_v7 = vadd.f32 %v564_v60, %v528_v59  ;;  %v425_v16 = vmul.f32 %v2179_v33, %v2122_v41  ;;  %v461_v17 = vmul.f32 %v2183_v36, %v2124_v42  ;;  %v2286_v26 = vld [vmem:[#allocation2 + $0x6a] sm:$0xff] }
  0x92   : > { %v898_v12 = vmax.f32 %v882_v22, 0.0  ;;  %v736_v13 = vadd.f32 %v720_v1, %v683_v0  ;;  %913 = vst.msk [vmem:[%s2259_s21 + $0x8] sm:$0xff] %vm283_vm0, %v897_v4  ;;  %v668_v23 = vmul.f32 %v2210_v9, %v2134_v53  ;;  %v824_v25 = vmul.f32 %v2146_v62, %v804_v6  ;;  %v2324_v1 = vld [vmem:[#allocation2 + $0x80] sm:$0xff] }
  0x93   : > { %v861_v18 = vmul.f32 %v2217_v11, %v839_v5  ;;  %v632_v20 = vadd.f32 %v616_v10, %v580_v7  ;;  %v477_v21 = vadd.f32 %v461_v17, %v425_v16  ;;  %v513_v33 = vmul.f32 %v2185_v37, %v2126_v43  ;;  %v2337_v17 = vld [vmem:[#allocation2 + $0x82] sm:$0xff] }
  0x94   : > { %914 = vst.msk [vmem:[%s2259_s21 + $0x10] sm:$0xff] %vm283_vm0, %v898_v12  ;;  %v788_v24 = vadd.f32 %v772_v3, %v736_v13  ;;  %v721_v28 = vmul.f32 %v2139_v57, %v2270_v56  ;;  %v773_v2 = vmul.f32 %v2141_v58, %v2272_v15  ;;  %v565_v32 = vmul.f32 %v2245_v47, %v2128_v46  ;;  %v2326_v3 = vld [vmem:[#allocation2 + $0x81] sm:$0xff] }
  0x95   : > { %v883_v36 = vadd.f32 %v2228_v61, %v861_v18  ;;  %v684_v27 = vadd.f32 %v668_v23, %v632_v20  ;;  %v529_v31 = vadd.f32 %v513_v33, %v477_v21  ;;  %v426_v37 = vmul.f32 %v2200_v63, %v2122_v41 }
  0x96   : > { %v840_v29 = vadd.f32 %v824_v25, %v788_v24  ;;  %v825_v39 = vmul.f32 %v2146_v62, %v2286_v26  ;;  %v462_v44 = vmul.f32 %v2208_v8, %v2124_v42  ;;  %v617_v14 = vmul.f32 %v2247_v35, %v2132_v52 }
  0x97   : > { %v899_v34 = vmax.f32 %v883_v36, 0.0  ;;  %v737_v38 = vadd.f32 %v721_v28, %v684_v27  ;;  %v581_v48 = vadd.f32 %v565_v32, %v529_v31  ;;  %v669_v19 = vmul.f32 %v804_v6, %v2134_v53  ;;  %v2353_v28 = vld [vmem:[#allocation2 + $0x90] sm:$0xff] }
  0x98   : > { %v862_v45 = vmul.f32 %v2217_v11, %v840_v29  ;;  %v722_v49 = vmul.f32 %v2139_v57, %v2297_v30  ;;  %v478_v51 = vadd.f32 %v462_v44, %v426_v37  ;;  %v514_v8 = vmul.f32 %v2210_v9, %v2126_v43 }
  0x99   : > { %915 = vst.msk [vmem:[%s2259_s21 + $0x18] sm:$0xff] %vm283_vm0, %v899_v34  ;;  %v789_v63 = vadd.f32 %v773_v2, %v737_v38  ;;  %v633_v55 = vadd.f32 %v617_v14, %v581_v48  ;;  %v774_v59 = vmul.f32 %v2141_v58, %v2303_v40  ;;  %v566_v60 = vmul.f32 %v2270_v56, %v2128_v46  ;;  %v2355_v2 = vld [vmem:[#allocation2 + $0x91] sm:$0xff] }
  0x9a   : > { %v884_v54 = vadd.f32 %v2228_v61, %v862_v45  ;;  %v530_v0 = vadd.f32 %v514_v8, %v478_v51  ;;  %v427_v4 = vmul.f32 %v2245_v47, %v2122_v41  ;;  %v463_v9 = vmul.f32 %v2247_v35, %v2124_v42  ;;  %v2365_v45 = vld [vmem:[#allocation2 + $0x92] sm:$0xff] }
  0x9b   : > { %v841_v22 = vadd.f32 %v825_v39, %v789_v63  ;;  %v685_v7 = vadd.f32 %v669_v19, %v633_v55  ;;  %v826_v10 = vmul.f32 %v2146_v62, %v2315_v50  ;;  %v618_v12 = vmul.f32 %v2272_v15, %v2132_v52 }
  0x9c   : > { %v900_v5 = vmax.f32 %v884_v54, 0.0  ;;  %v582_v16 = vadd.f32 %v566_v60, %v530_v0  ;;  %v479_v18 = vadd.f32 %v463_v9, %v427_v4  ;;  %v515_v20 = vmul.f32 %v804_v6, %v2126_v43  ;;  %v2382_v60 = vld [vmem:[#allocation2 + $0x98] sm:$0xff] }
  0x9d   : > { %v863_v13 = vmul.f32 %v2217_v11, %v841_v22  ;;  %v738_v47 = vadd.f32 %v722_v49, %v685_v7  ;;  %v670_v35 = vmul.f32 %v2286_v26, %v2134_v53  ;;  %v723_v23 = vmul.f32 %v2139_v57, %v2324_v1  ;;  %v2384_v22 = vld [vmem:[#allocation2 + $0x99] sm:$0xff] }
  0x9e   : > { %916 = vst.msk [vmem:[%s2259_s21 + $0x20] sm:$0xff] %vm283_vm0, %v900_v5  ;;  %v775_v24 = vmul.f32 %v2141_v58, %v2326_v3  ;;  %v634_v21 = vadd.f32 %v618_v12, %v582_v16  ;;  %v531_v33 = vadd.f32 %v515_v20, %v479_v18  ;;  %v567_v36 = vmul.f32 %v2297_v30, %v2128_v46  ;;  %v2393_v12 = vld [vmem:[#allocation2 + $0x9a] sm:$0xff] }
  0x9f   : > { %v885_v25 = vadd.f32 %v2228_v61, %v863_v13  ;;  %v790_v6 = vadd.f32 %v774_v59, %v738_v47  ;;  %v827_v27 = vmul.f32 %v2146_v62, %v2337_v17  ;;  %v428_v29 = vmul.f32 %v2270_v56, %v2122_v41 }
  0xa0   : > { %v464_v31 = vmul.f32 %v2272_v15, %v2124_v42  ;;  %v686_v37 = vadd.f32 %v670_v35, %v634_v21  ;;  %v583_v34 = vadd.f32 %v567_v36, %v531_v33  ;;  %v619_v38 = vmul.f32 %v2303_v40, %v2132_v52  ;;  %v2408_v33 = vld [vmem:[#allocation2 + $0xa8] sm:$0xff] }
  0xa1   : > { %v901_v32 = vmax.f32 %v885_v25, 0.0  ;;  %v842_v39 = vadd.f32 %v826_v10, %v790_v6  ;;  %v671_v44 = vmul.f32 %v2315_v50, %v2134_v53  ;;  %v516_v14 = vmul.f32 %v2286_v26, %v2126_v43 }
  0xa2   : > { %v480_v48 = vadd.f32 %v464_v31, %v428_v29  ;;  %v739_v56 = vadd.f32 %v723_v23, %v686_v37  ;;  %v635_v15 = vadd.f32 %v619_v38, %v583_v34  ;;  %v724_v19 = vmul.f32 %v2139_v57, %v2353_v28  ;;  %v2417_v37 = vld [vmem:[#allocation2 + $0xa9] sm:$0xff] }
  0xa3   : > { %917 = vst.msk [vmem:[%s2259_s21 + $0x28] sm:$0xff] %vm283_vm0, %v901_v32  ;;  %v776_v63 = vmul.f32 %v2141_v58, %v2355_v2  ;;  %v864_v49 = vmul.f32 %v2217_v11, %v842_v39  ;;  %v568_v8 = vmul.f32 %v2324_v1, %v2128_v46  ;;  %v429_v54 = vmul.f32 %v2297_v30, %v2122_v41 }
  0xa4   : > { %v532_v51 = vadd.f32 %v516_v14, %v480_v48  ;;  %v791_v26 = vadd.f32 %v775_v24, %v739_v56  ;;  %v687_v55 = vadd.f32 %v671_v44, %v635_v15  ;;  %v828_v59 = vmul.f32 %v2146_v62, %v2365_v45  ;;  %v2426_v56 = vld [vmem:[#allocation2 + $0xaa] sm:$0xff] }
  0xa5   : > { %v465_v0 = vmul.f32 %v2303_v40, %v2124_v42  ;;  %v886_v4 = vadd.f32 %v2228_v61, %v864_v49  ;;  %v620_v5 = vmul.f32 %v2326_v3, %v2132_v52  ;;  %v672_v30 = vmul.f32 %v2337_v17, %v2134_v53 }
  0xa6   : > { %v584_v9 = vadd.f32 %v568_v8, %v532_v51  ;;  %v843_v7 = vadd.f32 %v827_v27, %v791_v26  ;;  %v740_v10 = vadd.f32 %v724_v19, %v687_v55  ;;  %v517_v16 = vmul.f32 %v2315_v50, %v2126_v43  ;;  %v2435_v8 = vld [vmem:[#allocation2 + $0xb0] sm:$0xff] }
  0xa7   : > { %v481_v13 = vadd.f32 %v465_v0, %v429_v54  ;;  %v902_v18 = vmax.f32 %v886_v4, 0.0  ;;  %v725_v20 = vmul.f32 %v2139_v57, %v2382_v60  ;;  %v777_v47 = vmul.f32 %v2141_v58, %v2384_v22 }
  0xa8   : > { %v636_v40 = vadd.f32 %v620_v5, %v584_v9  ;;  %v865_v35 = vmul.f32 %v2217_v11, %v843_v7  ;;  %v792_v23 = vadd.f32 %v776_v63, %v740_v10  ;;  %v569_v25 = vmul.f32 %v2353_v28, %v2128_v46  ;;  %v2445_v9 = vld [vmem:[#allocation2 + $0xb1] sm:$0xff] }
  0xa9   : > { %v533_v24 = vadd.f32 %v517_v16, %v481_v13  ;;  %918 = vst.msk [vmem:[%s2259_s21 + $0x30] sm:$0xff] %vm283_vm0, %v902_v18  ;;  %v829_v50 = vmul.f32 %v2146_v62, %v2393_v12  ;;  %v430_v36 = vmul.f32 %v2324_v1, %v2122_v41  ;;  %v466_v6 = vmul.f32 %v2326_v3, %v2124_v42  ;;  %v2454_v18 = vld [vmem:[#allocation2 + $0xb2] sm:$0xff] }
  0xaa   : > { %v688_v21 = vadd.f32 %v672_v30, %v636_v40  ;;  %v887_v27 = vadd.f32 %v2228_v61, %v865_v35  ;;  %v844_v29 = vadd.f32 %v828_v59, %v792_v23  ;;  %v621_v32 = vmul.f32 %v2355_v2, %v2132_v52 }
  0xab   : > { %v585_v31 = vadd.f32 %v569_v25, %v533_v24  ;;  %v673_v38 = vmul.f32 %v2365_v45, %v2134_v53  ;;  %v482_v39 = vadd.f32 %v466_v6, %v430_v36  ;;  %v518_v1 = vmul.f32 %v2337_v17, %v2126_v43  ;;  %v2463_v24 = vld [vmem:[#allocation2 + $0xc0] sm:$0xff] }
  0xac   : > { %v741_v34 = vadd.f32 %v725_v20, %v688_v21  ;;  %v903_v44 = vmax.f32 %v887_v27, 0.0  ;;  %v866_v3 = vmul.f32 %v2217_v11, %v844_v29  ;;  %v726_v14 = vmul.f32 %v2139_v57, %v2408_v33  ;;  %v2473_v29 = vld [vmem:[#allocation2 + $0xc1] sm:$0xff] }
  0xad   : > { %v637_v48 = vadd.f32 %v621_v32, %v585_v31  ;;  %v778_v19 = vmul.f32 %v2141_v58, %v2417_v37  ;;  %v534_v63 = vadd.f32 %v518_v1, %v482_v39  ;;  %v570_v49 = vmul.f32 %v2382_v60, %v2128_v46 }
  0xae   : > { %v793_v15 = vadd.f32 %v777_v47, %v741_v34  ;;  %919 = vst.msk [vmem:[%s2259_s21 + $0x38] sm:$0xff] %vm283_vm0, %v903_v44  ;;  %v888_v17 = vadd.f32 %v2228_v61, %v866_v3  ;;  %v431_v54 = vmul.f32 %v2353_v28, %v2122_v41  ;;  %v467_v26 = vmul.f32 %v2355_v2, %v2124_v42  ;;  %v2482_v44 = vld [vmem:[#allocation2 + $0xc2] sm:$0xff] }
  0xaf   : > { %v689_v51 = vadd.f32 %v673_v38, %v637_v48  ;;  %v830_v59 = vmul.f32 %v2146_v62, %v2426_v56  ;;  %v586_v0 = vadd.f32 %v570_v49, %v534_v63  ;;  %v622_v4 = vmul.f32 %v2384_v22, %v2132_v52  ;;  %v2491_v63 = vld [vmem:[#allocation2 + $0xc8] sm:$0xff] }
  0xb0   : > { %v845_v55 = vadd.f32 %v829_v50, %v793_v15  ;;  %v904_v5 = vmax.f32 %v888_v17, 0.0  ;;  %v483_v7 = vadd.f32 %v467_v26, %v431_v54  ;;  %v519_v28 = vmul.f32 %v2365_v45, %v2126_v43 }
  0xb1   : > { %v742_v30 = vadd.f32 %v726_v14, %v689_v51  ;;  %v638_v13 = vadd.f32 %v622_v4, %v586_v0  ;;  %v674_v2 = vmul.f32 %v2393_v12, %v2134_v53  ;;  %v727_v16 = vmul.f32 %v2139_v57, %v2435_v8 }
  0xb2   : > { %v867_v10 = vmul.f32 %v2217_v11, %v845_v55  ;;  %920 = vst.msk [vmem:[%s2259_s21 + $0x40] sm:$0xff] %vm283_vm0, %v904_v5  ;;  %v779_v20 = vmul.f32 %v2141_v58, %v2445_v9  ;;  %v535_v47 = vadd.f32 %v519_v28, %v483_v7  ;;  %v571_v45 = vmul.f32 %v2408_v33, %v2128_v46 }
  0xb3   : > { %v794_v40 = vadd.f32 %v778_v19, %v742_v30  ;;  %v690_v23 = vadd.f32 %v674_v2, %v638_v13  ;;  %v432_v25 = vmul.f32 %v2382_v60, %v2122_v41  ;;  %v468_v21 = vmul.f32 %v2384_v22, %v2124_v42 }
  0xb4   : > { %v889_v35 = vadd.f32 %v2228_v61, %v867_v10  ;;  %v831_v36 = vmul.f32 %v2146_v62, %v2454_v18  ;;  %v587_v6 = vadd.f32 %v571_v45, %v535_v47  ;;  %v623_v27 = vmul.f32 %v2417_v37, %v2132_v52  ;;  %v2510_v10 = vld [vmem:[#allocation2 + $0xca] sm:$0xff]  ;;  %v2519_v47 = vld [vmem:[#allocation2 + $0xd8] sm:$0xff] }
  0xb5   : > { %v846_v50 = vadd.f32 %v830_v59, %v794_v40  ;;  %v743_v32 = vadd.f32 %v727_v16, %v690_v23  ;;  %v484_v34 = vadd.f32 %v468_v21, %v432_v25  ;;  %v520_v60 = vmul.f32 %v2393_v12, %v2126_v43  ;;  %v2501_v59 = vld [vmem:[#allocation2 + $0xc9] sm:$0xff] }
  0xb6   : > { %v905_v31 = vmax.f32 %v889_v35, 0.0  ;;  %v639_v39 = vadd.f32 %v623_v27, %v587_v6  ;;  %v675_v22 = vmul.f32 %v2426_v56, %v2134_v53  ;;  %v728_v1 = vmul.f32 %v2139_v57, %v2463_v24 }
  0xb7   : > { %v868_v38 = vmul.f32 %v2217_v11, %v846_v50  ;;  %v795_v3 = vadd.f32 %v779_v20, %v743_v32  ;;  %v780_v48 = vmul.f32 %v2141_v58, %v2473_v29  ;;  %v536_v14 = vadd.f32 %v520_v60, %v484_v34 }
  0xb8   : > { %921 = vst.msk [vmem:[%s2259_s21 + $0x48] sm:$0xff] %vm283_vm0, %v905_v31  ;;  %v572_v12 = vmul.f32 %v2435_v8, %v2128_v46  ;;  %v691_v19 = vadd.f32 %v675_v22, %v639_v39  ;;  %v433_v49 = vmul.f32 %v2408_v33, %v2122_v41  ;;  %v469_v17 = vmul.f32 %v2417_v37, %v2124_v42 }
  0xb9   : > { %v890_v15 = vadd.f32 %v2228_v61, %v868_v38  ;;  %v847_v51 = vadd.f32 %v831_v36, %v795_v3  ;;  %v832_v54 = vmul.f32 %v2146_v62, %v2482_v44  ;;  %v624_v55 = vmul.f32 %v2445_v9, %v2132_v52  ;;  %v2529_v36 = vld [vmem:[#allocation2 + $0xd9] sm:$0xff] }
  0xba   : > { %v588_v26 = vadd.f32 %v572_v12, %v536_v14  ;;  %v744_v4 = vadd.f32 %v728_v1, %v691_v19  ;;  %v485_v5 = vadd.f32 %v469_v17, %v433_v49  ;;  %v521_v33 = vmul.f32 %v2426_v56, %v2126_v43  ;;  %v2538_v38 = vld [vmem:[#allocation2 + $0xda] sm:$0xff] }
  0xbb   : > { %v906_v0 = vmax.f32 %v890_v15, 0.0  ;;  %v869_v30 = vmul.f32 %v2217_v11, %v847_v51  ;;  %v676_v37 = vmul.f32 %v2454_v18, %v2134_v53  ;;  %v729_v28 = vmul.f32 %v2139_v57, %v2491_v63  ;;  %v2547_v14 = vld [vmem:[#allocation2 + $0xe0] sm:$0xff] }
  0xbc   : > { %v640_v7 = vadd.f32 %v624_v55, %v588_v26  ;;  %v796_v13 = vadd.f32 %v780_v48, %v744_v4  ;;  %v781_v2 = vmul.f32 %v2141_v58, %v2501_v59  ;;  %v537_v16 = vadd.f32 %v521_v33, %v485_v5 }
  0xbd   : > { %922 = vst.msk [vmem:[%s2259_s21 + $0x50] sm:$0xff] %vm283_vm0, %v906_v0  ;;  %v573_v56 = vmul.f32 %v2463_v24, %v2128_v46  ;;  %v891_v40 = vadd.f32 %v2228_v61, %v869_v30  ;;  %v434_v45 = vmul.f32 %v2435_v8, %v2122_v41  ;;  %v470_v35 = vmul.f32 %v2445_v9, %v2124_v42  ;;  %v2566_v30 = vld [vmem:[#allocation2 + $0xe2] sm:$0xff] }
  0xbe   : > { %v692_v20 = vadd.f32 %v676_v37, %v640_v7  ;;  %v848_v23 = vadd.f32 %v832_v54, %v796_v13  ;;  %v833_v25 = vmul.f32 %v2146_v62, %v2510_v10  ;;  %v625_v50 = vmul.f32 %v2473_v29, %v2132_v52  ;;  %v2557_v54 = vld [vmem:[#allocation2 + $0xe1] sm:$0xff] }
  0xbf   : > { %v589_v21 = vadd.f32 %v573_v56, %v537_v16  ;;  %v907_v6 = vmax.f32 %v891_v40, 0.0  ;;  %v486_v31 = vadd.f32 %v470_v35, %v434_v45  ;;  %v522_v8 = vmul.f32 %v2454_v18, %v2126_v43  ;;  %v2575_v16 = vld [vmem:[#allocation2 + $0xf0] sm:$0xff] }
  0xc0   : > { %v745_v27 = vadd.f32 %v729_v28, %v692_v20  ;;  %v870_v32 = vmul.f32 %v2217_v11, %v848_v23  ;;  %v677_v9 = vmul.f32 %v2482_v44, %v2134_v53  ;;  %v730_v60 = vmul.f32 %v2139_v57, %v2519_v47 }
  0xc1   : > { %v641_v34 = vadd.f32 %v625_v50, %v589_v21  ;;  %923 = vst.msk [vmem:[%s2259_s21 + $0x58] sm:$0xff] %vm283_vm0, %v907_v6  ;;  %v782_v22 = vmul.f32 %v2141_v58, %v2529_v36  ;;  %v538_v1 = vadd.f32 %v522_v8, %v486_v31  ;;  %v574_v18 = vmul.f32 %v2491_v63, %v2128_v46 }
  0xc2   : > { %v797_v39 = vadd.f32 %v781_v2, %v745_v27  ;;  %v892_v3 = vadd.f32 %v2228_v61, %v870_v32  ;;  %v945_v12 = vmul.f32 %v2463_v24, %v2122_v41  ;;  %v977_v15 = vmul.f32 %v2473_v29, %v2124_v42  ;;  %v2594_v32 = vld [vmem:[#allocation2 + $0xf2] sm:$0xff] }
  0xc3   : > { %v693_v48 = vadd.f32 %v677_v9, %v641_v34  ;;  %v834_v49 = vmul.f32 %v2146_v62, %v2538_v38  ;;  %v590_v17 = vadd.f32 %v574_v18, %v538_v1  ;;  %v626_v51 = vmul.f32 %v2501_v59, %v2132_v52  ;;  %v2603_v1 = vld [vmem:[#allocation2 + $0xf8] sm:$0xff] }
  0xc4   : > { %v849_v19 = vadd.f32 %v833_v25, %v797_v39  ;;  %v908_v26 = vmax.f32 %v892_v3, 0.0  ;;  %v993_v0 = vadd.f32 %v977_v15, %v945_v12  ;;  %v1025_v24 = vmul.f32 %v2482_v44, %v2126_v43  ;;  %v2585_v25 = vld [vmem:[#allocation2 + $0xf1] sm:$0xff] }
  0xc5   : > { %v746_v55 = vadd.f32 %v730_v60, %v693_v48  ;;  %v642_v5 = vadd.f32 %v626_v51, %v590_v17  ;;  %v678_v29 = vmul.f32 %v2510_v10, %v2134_v53  ;;  %v731_v33 = vmul.f32 %v2139_v57, %v2547_v14 }
  0xc6   : > { %v871_v4 = vmul.f32 %v2217_v11, %v849_v19  ;;  %924 = vst.msk [vmem:[%s2259_s21 + $0x60] sm:$0xff] %vm283_vm0, %v908_v26  ;;  %v783_v37 = vmul.f32 %v2141_v58, %v2557_v54  ;;  %v1041_v28 = vadd.f32 %v1025_v24, %v993_v0  ;;  %v1074_v44 = vmul.f32 %v2519_v47, %v2128_v46 }
  0xc7   : > { %v798_v7 = vadd.f32 %v782_v22, %v746_v55  ;;  %v694_v2 = vadd.f32 %v678_v29, %v642_v5  ;;  %v946_v56 = vmul.f32 %v2491_v63, %v2122_v41  ;;  %v978_v40 = vmul.f32 %v2501_v59, %v2124_v42 }
  0xc8   : > { %v893_v13 = vadd.f32 %v2228_v61, %v871_v4  ;;  %v835_v45 = vmul.f32 %v2146_v62, %v2566_v30  ;;  %v1090_v35 = vadd.f32 %v1074_v44, %v1041_v28  ;;  %v1122_v23 = vmul.f32 %v2529_v36, %v2132_v52  ;;  %v2622_v4 = vld [vmem:[#allocation2 + $0xfa] sm:$0xff]  ;;  %v2631_v28 = vld [vmem:[#allocation2 + $0x108] sm:$0xff] }
  0xc9   : > { %v850_v20 = vadd.f32 %v834_v49, %v798_v7  ;;  %v747_v50 = vadd.f32 %v731_v33, %v694_v2  ;;  %v994_v6 = vadd.f32 %v978_v40, %v946_v56  ;;  %v1026_v63 = vmul.f32 %v2510_v10, %v2126_v43  ;;  %v2613_v49 = vld [vmem:[#allocation2 + $0xf9] sm:$0xff] }
  0xca   : > { %v909_v21 = vmax.f32 %v893_v13, 0.0  ;;  %v1138_v31 = vadd.f32 %v1122_v23, %v1090_v35  ;;  %v1170_v59 = vmul.f32 %v2538_v38, %v2134_v53  ;;  %v1219_v8 = vmul.f32 %v2575_v16, %v2139_v57 }
  0xcb   : > { %v872_v27 = vmul.f32 %v2217_v11, %v850_v20  ;;  %v799_v34 = vadd.f32 %v783_v37, %v747_v50  ;;  %v1267_v9 = vmul.f32 %v2585_v25, %v2141_v58  ;;  %v1042_v60 = vadd.f32 %v1026_v63, %v994_v6 }
  0xcc   : > { %925 = vst.msk [vmem:[%s2259_s21 + $0x68] sm:$0xff] %vm283_vm0, %v909_v21  ;;  %v1075_v10 = vmul.f32 %v2547_v14, %v2128_v46  ;;  %v1186_v22 = vadd.f32 %v1170_v59, %v1138_v31  ;;  %v947_v18 = vmul.f32 %v2519_v47, %v2122_v41  ;;  %v979_v3 = vmul.f32 %v2529_v36, %v2124_v42 }
  0xcd   : > { %v894_v39 = vadd.f32 %v2228_v61, %v872_v27  ;;  %v851_v48 = vadd.f32 %v835_v45, %v799_v34  ;;  %v1315_v12 = vmul.f32 %v2594_v32, %v2146_v62  ;;  %v1123_v19 = vmul.f32 %v2557_v54, %v2132_v52  ;;  %v2641_v45 = vld [vmem:[#allocation2 + $0x109] sm:$0xff] }
  0xce   : > { %v1091_v15 = vadd.f32 %v1075_v10, %v1042_v60  ;;  %v1235_v51 = vadd.f32 %v1219_v8, %v1186_v22  ;;  %v995_v26 = vadd.f32 %v979_v3, %v947_v18  ;;  %v1027_v47 = vmul.f32 %v2538_v38, %v2126_v43  ;;  %v2650_v27 = vld [vmem:[#allocation2 + $0x10a] sm:$0xff] }
  0xcf   : > { %v910_v17 = vmax.f32 %v894_v39, 0.0  ;;  %v873_v55 = vmul.f32 %v2217_v11, %v851_v48  ;;  %v1171_v36 = vmul.f32 %v2566_v30, %v2134_v53  ;;  %v1220_v24 = vmul.f32 %v2603_v1, %v2139_v57  ;;  %v2659_v60 = vld [vmem:[#allocation2 + $0x110] sm:$0xff] }
  0xd0   : > { %v1139_v0 = vadd.f32 %v1123_v19, %v1091_v15  ;;  %v1283_v5 = vadd.f32 %v1267_v9, %v1235_v51  ;;  %v1268_v29 = vmul.f32 %v2613_v49, %v2141_v58  ;;  %v1043_v33 = vadd.f32 %v1027_v47, %v995_v26 }
  0xd1   : > { %926 = vst.msk [vmem:[%s2259_s21 + $0x70] sm:$0xff] %vm283_vm0, %v910_v17  ;;  %v1076_v38 = vmul.f32 %v2575_v16, %v2128_v46  ;;  %v895_v7 = vadd.f32 %v2228_v61, %v873_v55  ;;  %v948_v44 = vmul.f32 %v2547_v14, %v2122_v41  ;;  %v980_v13 = vmul.f32 %v2557_v54, %v2124_v42  ;;  %v2678_v55 = vld [vmem:[#allocation2 + $0x112] sm:$0xff] }
  0xd2   : > { %v1187_v37 = vadd.f32 %v1171_v36, %v1139_v0  ;;  %v1331_v2 = vadd.f32 %v1315_v12, %v1283_v5  ;;  %v1316_v56 = vmul.f32 %v2622_v4, %v2146_v62  ;;  %v1124_v20 = vmul.f32 %v2585_v25, %v2132_v52  ;;  %v2669_v12 = vld [vmem:[#allocation2 + $0x111] sm:$0xff] }
  0xd3   : > { %v1092_v40 = vadd.f32 %v1076_v38, %v1043_v33  ;;  %v911_v35 = vmax.f32 %v895_v7, 0.0  ;;  %v996_v21 = vadd.f32 %v980_v13, %v948_v44  ;;  %v1028_v14 = vmul.f32 %v2566_v30, %v2126_v43  ;;  %v2687_v33 = vld [vmem:[#allocation2 + $0x120] sm:$0xff] }
  0xd4   : > { %v1236_v23 = vadd.f32 %v1220_v24, %v1187_v37  ;;  %v1347_v50 = vmul.f32 %v2217_v11, %v1331_v2  ;;  %v1172_v54 = vmul.f32 %v2594_v32, %v2134_v53  ;;  %v1221_v63 = vmul.f32 %v2631_v28, %v2139_v57 }
  0xd5   : > { %v1140_v6 = vadd.f32 %v1124_v20, %v1092_v40  ;;  %927 = vst.msk [vmem:[%s2259_s21 + $0x78] sm:$0xff] %vm283_vm0, %v911_v35  ;;  %v1269_v59 = vmul.f32 %v2641_v45, %v2141_v58  ;;  %v1044_v8 = vadd.f32 %v1028_v14, %v996_v21  ;;  %v1077_v30 = vmul.f32 %v2603_v1, %v2128_v46 }
  0xd6   : > { %v1284_v31 = vadd.f32 %v1268_v29, %v1236_v23  ;;  %v1363_v34 = vadd.f32 %v2228_v61, %v1347_v50  ;;  %v949_v10 = vmul.f32 %v2575_v16, %v2122_v41  ;;  %v981_v39 = vmul.f32 %v2585_v25, %v2124_v42  ;;  %v2706_v50 = vld [vmem:[#allocation2 + $0x122] sm:$0xff] }
  0xd7   : > { %v1188_v9 = vadd.f32 %v1172_v54, %v1140_v6  ;;  %v1317_v18 = vmul.f32 %v2650_v27, %v2146_v62  ;;  %v1093_v3 = vadd.f32 %v1077_v30, %v1044_v8  ;;  %v1125_v48 = vmul.f32 %v2613_v49, %v2132_v52  ;;  %v2715_v8 = vld [vmem:[#allocation2 + $0x128] sm:$0xff] }
  0xd8   : > { %v1332_v22 = vadd.f32 %v1316_v56, %v1284_v31  ;;  %v1379_v15 = vmax.f32 %v1363_v34, 0.0  ;;  %v997_v17 = vadd.f32 %v981_v39, %v949_v10  ;;  %v1029_v16 = vmul.f32 %v2594_v32, %v2126_v43  ;;  %v2697_v56 = vld [vmem:[#allocation2 + $0x121] sm:$0xff] }
  0xd9   : > { %v1237_v19 = vadd.f32 %v1221_v63, %v1188_v9  ;;  %v1141_v26 = vadd.f32 %v1125_v48, %v1093_v3  ;;  %v1173_v25 = vmul.f32 %v2622_v4, %v2134_v53  ;;  %v1222_v47 = vmul.f32 %v2659_v60, %v2139_v57 }
  0xda   : > { %v1348_v51 = vmul.f32 %v2217_v11, %v1332_v22  ;;  %1564 = vst.msk [vmem:[%s2259_s21 + $0x80] sm:$0xff] %vm283_vm0, %v1379_v15  ;;  %v1270_v36 = vmul.f32 %v2669_v12, %v2141_v58  ;;  %v1045_v24 = vadd.f32 %v1029_v16, %v997_v17  ;;  %v1078_v32 = vmul.f32 %v2631_v28, %v2128_v46 }
  0xdb   : > { %v1285_v0 = vadd.f32 %v1269_v59, %v1237_v19  ;;  %v1189_v29 = vadd.f32 %v1173_v25, %v1141_v26  ;;  %v950_v38 = vmul.f32 %v2603_v1, %v2122_v41  ;;  %v982_v7 = vmul.f32 %v2613_v49, %v2124_v42 }
  0xdc   : > { %v1364_v5 = vadd.f32 %v2228_v61, %v1348_v51  ;;  %v1318_v44 = vmul.f32 %v2678_v55, %v2146_v62  ;;  %v1094_v13 = vadd.f32 %v1078_v32, %v1045_v24  ;;  %v1126_v2 = vmul.f32 %v2641_v45, %v2132_v52  ;;  %v2734_v51 = vld [vmem:[#allocation2 + $0x12a] sm:$0xff]  ;;  %v2743_v24 = vld [vmem:[#allocation2 + $0x138] sm:$0xff] }
  0xdd   : > { %v1333_v37 = vadd.f32 %v1317_v18, %v1285_v0  ;;  %v1238_v20 = vadd.f32 %v1222_v47, %v1189_v29  ;;  %v998_v35 = vadd.f32 %v982_v7, %v950_v38  ;;  %v1030_v1 = vmul.f32 %v2622_v4, %v2126_v43  ;;  %v2725_v18 = vld [vmem:[#allocation2 + $0x129] sm:$0xff] }
  0xde   : > { %v1380_v40 = vmax.f32 %v1364_v5, 0.0  ;;  %v1142_v21 = vadd.f32 %v1126_v2, %v1094_v13  ;;  %v1174_v49 = vmul.f32 %v2650_v27, %v2134_v53  ;;  %v1223_v14 = vmul.f32 %v2687_v33, %v2139_v57 }
  0xdf   : > { %v1349_v23 = vmul.f32 %v2217_v11, %v1333_v37  ;;  %v1286_v6 = vadd.f32 %v1270_v36, %v1238_v20  ;;  %v1271_v54 = vmul.f32 %v2697_v56, %v2141_v58  ;;  %v1046_v63 = vadd.f32 %v1030_v1, %v998_v35 }
  0xe0   : > { %1565 = vst.msk [vmem:[%s2259_s21 + $0x88] sm:$0xff] %vm283_vm0, %v1380_v40  ;;  %v1079_v4 = vmul.f32 %v2659_v60, %v2128_v46  ;;  %v1190_v59 = vadd.f32 %v1174_v49, %v1142_v21  ;;  %v951_v30 = vmul.f32 %v2631_v28, %v2122_v41  ;;  %v983_v34 = vmul.f32 %v2641_v45, %v2124_v42 }
  0xe1   : > { %v1365_v31 = vadd.f32 %v2228_v61, %v1349_v23  ;;  %v1334_v9 = vadd.f32 %v1318_v44, %v1286_v6  ;;  %v1319_v10 = vmul.f32 %v2706_v50, %v2146_v62  ;;  %v1127_v22 = vmul.f32 %v2669_v12, %v2132_v52  ;;  %v2753_v44 = vld [vmem:[#allocation2 + $0x139] sm:$0xff] }
  0xe2   : > { %v1095_v39 = vadd.f32 %v1079_v4, %v1046_v63  ;;  %v1239_v48 = vadd.f32 %v1223_v14, %v1190_v59  ;;  %v999_v15 = vadd.f32 %v983_v34, %v951_v30  ;;  %v1031_v28 = vmul.f32 %v2650_v27, %v2126_v43  ;;  %v2762_v23 = vld [vmem:[#allocation2 + $0x13a] sm:$0xff] }
  0xe3   : > { %v1381_v3 = vmax.f32 %v1365_v31, 0.0  ;;  %v1350_v19 = vmul.f32 %v2217_v11, %v1334_v9  ;;  %v1175_v45 = vmul.f32 %v2678_v55, %v2134_v53  ;;  %v1224_v16 = vmul.f32 %v2715_v8, %v2139_v57  ;;  %v2771_v63 = vld [vmem:[#allocation2 + $0x140] sm:$0xff] }
  0xe4   : > { %v1143_v17 = vadd.f32 %v1127_v22, %v1095_v39  ;;  %v1287_v26 = vadd.f32 %v1271_v54, %v1239_v48  ;;  %v1272_v25 = vmul.f32 %v2725_v18, %v2141_v58  ;;  %v1047_v47 = vadd.f32 %v1031_v28, %v999_v15 }
  0xe5   : > { %1566 = vst.msk [vmem:[%s2259_s21 + $0x90] sm:$0xff] %vm283_vm0, %v1381_v3  ;;  %v1080_v27 = vmul.f32 %v2687_v33, %v2128_v46  ;;  %v1366_v0 = vadd.f32 %v2228_v61, %v1350_v19  ;;  %v952_v32 = vmul.f32 %v2659_v60, %v2122_v41  ;;  %v984_v5 = vmul.f32 %v2669_v12, %v2124_v42  ;;  %v2790_v19 = vld [vmem:[#allocation2 + $0x142] sm:$0xff] }
  0xe6   : > { %v1191_v36 = vadd.f32 %v1175_v45, %v1143_v17  ;;  %v1335_v29 = vadd.f32 %v1319_v10, %v1287_v26  ;;  %v1320_v38 = vmul.f32 %v2734_v51, %v2146_v62  ;;  %v1128_v37 = vmul.f32 %v2697_v56, %v2132_v52  ;;  %v2781_v10 = vld [vmem:[#allocation2 + $0x141] sm:$0xff] }
  0xe7   : > { %v1096_v7 = vadd.f32 %v1080_v27, %v1047_v47  ;;  %v1382_v13 = vmax.f32 %v1366_v0, 0.0  ;;  %v1000_v40 = vadd.f32 %v984_v5, %v952_v32  ;;  %v1032_v60 = vmul.f32 %v2678_v55, %v2126_v43 }
  0xe8   : > { %v1240_v2 = vadd.f32 %v1224_v16, %v1191_v36  ;;  %v1351_v20 = vmul.f32 %v2217_v11, %v1335_v29  ;;  %v1176_v12 = vmul.f32 %v2706_v50, %v2134_v53  ;;  %v1225_v1 = vmul.f32 %v2743_v24, %v2139_v57  ;;  %v2809_v29 = vld [vmem:[#allocation2 + $0x151] sm:$0xff] }
  0xe9   : > { %v1144_v35 = vadd.f32 %v1128_v37, %v1096_v7  ;;  %1567 = vst.msk [vmem:[%s2259_s21 + $0x98] sm:$0xff] %vm283_vm0, %v1382_v13  ;;  %v1273_v49 = vmul.f32 %v2753_v44, %v2141_v58  ;;  %v1048_v14 = vadd.f32 %v1032_v60, %v1000_v40  ;;  %v1081_v55 = vmul.f32 %v2715_v8, %v2128_v46  ;;  %v2823_v60 = vld [vmem:[#allocation2 + $0x152] sm:$0xff] }
  0xea   : > { %v1288_v21 = vadd.f32 %v1272_v25, %v1240_v2  ;;  %v1367_v6 = vadd.f32 %v2228_v61, %v1351_v20  ;;  %v953_v4 = vmul.f32 %v2687_v33, %v2122_v41  ;;  %v985_v31 = vmul.f32 %v2697_v56, %v2124_v42  ;;  %v2799_v25 = vld [vmem:[#allocation2 + $0x150] sm:$0xff] }
  0xeb   : > { %v1192_v54 = vadd.f32 %v1176_v12, %v1144_v35  ;;  %v1321_v30 = vmul.f32 %v2762_v23, %v2146_v62  ;;  %v1097_v34 = vadd.f32 %v1081_v55, %v1048_v14  ;;  %v1129_v9 = vmul.f32 %v2725_v18, %v2132_v52  ;;  %v2837_v14 = vld [vmem:[#allocation2 + $0x158] sm:$0xff] }
  0xec   : > { %v1336_v59 = vadd.f32 %v1320_v38, %v1288_v21  ;;  %v1383_v39 = vmax.f32 %v1367_v6, 0.0  ;;  %v1001_v3 = vadd.f32 %v985_v31, %v953_v4  ;;  %v1033_v33 = vmul.f32 %v2706_v50, %v2126_v43 }
  0xed   : > { %v1241_v22 = vadd.f32 %v1225_v1, %v1192_v54  ;;  %v1145_v15 = vadd.f32 %v1129_v9, %v1097_v34  ;;  %v1177_v56 = vmul.f32 %v2734_v51, %v2134_v53  ;;  %v1226_v28 = vmul.f32 %v2771_v63, %v2139_v57  ;;  %v2834_v1 = vld [vmem:[%s3049_s3] ss:$0 sm:$0xff] }
  0xee   : > { %v1352_v48 = vmul.f32 %v2217_v11, %v1336_v59  ;;  %1568 = vst.msk [vmem:[%s2259_s21 + $0xa0] sm:$0xff] %vm283_vm0, %v1383_v39  ;;  %v1274_v45 = vmul.f32 %v2781_v10, %v2141_v58  ;;  %v1049_v16 = vadd.f32 %v1033_v33, %v1001_v3  ;;  %v1082_v50 = vmul.f32 %v2743_v24, %v2128_v46 }
  0xef   : > { %v1289_v17 = vadd.f32 %v1273_v49, %v1241_v22  ;;  %v1193_v26 = vadd.f32 %v1177_v56, %v1145_v15  ;;  %v954_v47 = vmul.f32 %v2715_v8, %v2122_v41  ;;  %v986_v27 = vmul.f32 %v2725_v18, %v2124_v42  ;;  %v2816_v18 = vld [vmem:[%s3048_s2] ss:$0 sm:$0xff] }
  0xf0   : > { %v1368_v11 = vadd.f32 %v2228_v61, %v1352_v48  ;;  %v1322_v36 = vmul.f32 %v2790_v19, %v2146_v62  ;;  %v1098_v32 = vadd.f32 %v1082_v50, %v1049_v16  ;;  %v1130_v5 = vmul.f32 %v2753_v44, %v2132_v52  ;;  %v2856_v48 = vld [vmem:[#allocation2 + $0x15a] sm:$0xff]  ;;  %v2865_v16 = vld [vmem:[#allocation2 + $0x168] sm:$0xff] }
  0xf1   : > { %v1337_v0 = vadd.f32 %v1321_v30, %v1289_v17  ;;  %v1242_v38 = vadd.f32 %v1226_v28, %v1193_v26  ;;  %v1002_v7 = vadd.f32 %v986_v27, %v954_v47  ;;  %v1034_v8 = vmul.f32 %v2734_v51, %v2126_v43  ;;  %v2847_v30 = vld [vmem:[#allocation2 + $0x159] sm:$0xff] }
  0xf2   : > { %v1384_v61 = vmax.f32 %v1368_v11, 0.0  ;;  %v1146_v13 = vadd.f32 %v1130_v5, %v1098_v32  ;;  %v1178_v2 = vmul.f32 %v2762_v23, %v2134_v53  ;;  %v1227_v40 = vmul.f32 %v2799_v25, %v2139_v57 }
  0xf3   : > { %v1353_v37 = vmul.f32 %v2816_v18, %v1337_v0  ;;  %v1290_v20 = vadd.f32 %v1274_v45, %v1242_v38  ;;  %v1275_v51 = vmul.f32 %v2809_v29, %v2141_v58  ;;  %v1050_v35 = vadd.f32 %v1034_v8, %v1002_v7 }
  0xf4   : > { %1569 = vst.msk [vmem:[%s2259_s21 + $0xa8] sm:$0xff] %vm283_vm0, %v1384_v61  ;;  %v1083_v12 = vmul.f32 %v2771_v63, %v2128_v46  ;;  %v1194_v49 = vadd.f32 %v1178_v2, %v1146_v13  ;;  %v955_v55 = vmul.f32 %v2743_v24, %v2122_v41  ;;  %v987_v6 = vmul.f32 %v2753_v44, %v2124_v42 }
  0xf5   : > { %v1369_v21 = vadd.f32 %v2834_v1, %v1353_v37  ;;  %v1338_v54 = vadd.f32 %v1322_v36, %v1290_v20  ;;  %v1323_v4 = vmul.f32 %v2823_v60, %v2146_v62  ;;  %v1131_v59 = vmul.f32 %v2781_v10, %v2132_v52  ;;  %v2875_v36 = vld [vmem:[#allocation2 + $0x169] sm:$0xff] }
  0xf6   : > { %v1099_v31 = vadd.f32 %v1083_v12, %v1050_v35  ;;  %v1243_v9 = vadd.f32 %v1227_v40, %v1194_v49  ;;  %v1003_v39 = vadd.f32 %v987_v6, %v955_v55  ;;  %v1035_v24 = vmul.f32 %v2762_v23, %v2126_v43  ;;  %v2884_v37 = vld [vmem:[#allocation2 + $0x16a] sm:$0xff] }
  0xf7   : > { %v1385_v34 = vmax.f32 %v1369_v21, 0.0  ;;  %v1354_v22 = vmul.f32 %v2816_v18, %v1338_v54  ;;  %v1179_v44 = vmul.f32 %v2790_v19, %v2134_v53  ;;  %v1228_v33 = vmul.f32 %v2837_v14, %v2139_v57  ;;  %v2893_v35 = vld [vmem:[#allocation2 + $0x170] sm:$0xff] }
  0xf8   : > { %v1147_v3 = vadd.f32 %v1131_v59, %v1099_v31  ;;  %v1291_v15 = vadd.f32 %v1275_v51, %v1243_v9  ;;  %v1276_v56 = vmul.f32 %v2847_v30, %v2141_v58  ;;  %v1051_v28 = vadd.f32 %v1035_v24, %v1003_v39 }
  0xf9   : > { %1570 = vst.msk [vmem:[%s2259_s21 + $0xb0] sm:$0xff] %vm283_vm0, %v1385_v34  ;;  %v1084_v23 = vmul.f32 %v2799_v25, %v2128_v46  ;;  %v1370_v17 = vadd.f32 %v2834_v1, %v1354_v22  ;;  %v956_v50 = vmul.f32 %v2771_v63, %v2122_v41  ;;  %v988_v11 = vmul.f32 %v2781_v10, %v2124_v42  ;;  %v1310_v22 = vld [vmem:[#allocation2 + $0x172] sm:$0xff] }
  0xfa   : > { %v1195_v45 = vadd.f32 %v1179_v44, %v1147_v3  ;;  %v1339_v26 = vadd.f32 %v1323_v4, %v1291_v15  ;;  %v1324_v47 = vmul.f32 %v2856_v48, %v2146_v62  ;;  %v1132_v0 = vmul.f32 %v2809_v29, %v2132_v52  ;;  %v2903_v4 = vld [vmem:[#allocation2 + $0x171] sm:$0xff] }
  0xfb   : > { %v1100_v27 = vadd.f32 %v1084_v23, %v1051_v28  ;;  %v1386_v32 = vmax.f32 %v1370_v17, 0.0  ;;  %v1004_v61 = vadd.f32 %v988_v11, %v956_v50  ;;  %v1036_v63 = vmul.f32 %v2790_v19, %v2126_v43  ;;  %v1215_v28 = vld [vmem:[#allocation2 + $0x180] sm:$0xff] }
  0xfc   : > { %v1244_v5 = vadd.f32 %v1228_v33, %v1195_v45  ;;  %v1355_v38 = vmul.f32 %v2816_v18, %v1339_v26  ;;  %v1180_v10 = vmul.f32 %v2823_v60, %v2134_v53  ;;  %v1229_v8 = vmul.f32 %v2865_v16, %v2139_v57 }
  0xfd   : > { %v1148_v7 = vadd.f32 %v1132_v0, %v1100_v27  ;;  %1571 = vst.msk [vmem:[%s2259_s21 + $0xb8] sm:$0xff] %vm283_vm0, %v1386_v32  ;;  %v1277_v2 = vmul.f32 %v2875_v36, %v2141_v58  ;;  %v1052_v40 = vadd.f32 %v1036_v63, %v1004_v61  ;;  %v1085_v19 = vmul.f32 %v2837_v14, %v2128_v46 }
  0xfe   : > { %v1292_v13 = vadd.f32 %v1276_v56, %v1244_v5  ;;  %v1371_v20 = vadd.f32 %v2834_v1, %v1355_v38  ;;  %v957_v12 = vmul.f32 %v2799_v25, %v2122_v41  ;;  %v989_v21 = vmul.f32 %v2809_v29, %v2124_v42 }
  0xff   : > { %v1196_v51 = vadd.f32 %v1180_v10, %v1148_v7  ;;  %v1325_v55 = vmul.f32 %v2884_v37, %v2146_v62  ;;  %v1101_v6 = vadd.f32 %v1085_v19, %v1052_v40  ;;  %v1133_v54 = vmul.f32 %v2847_v30, %v2132_v52 }
 0x100   : > { %v1340_v49 = vadd.f32 %v1324_v47, %v1292_v13  ;;  %v1387_v31 = vmax.f32 %v1371_v20, 0.0  ;;  %v1005_v34 = vadd.f32 %v989_v21, %v957_v12  ;;  %v1037_v25 = vmul.f32 %v2823_v60, %v2126_v43  ;;  %v1263_v47 = vld [vmem:[#allocation2 + $0x181] sm:$0xff] }
 0x101   : > { %v1245_v59 = vadd.f32 %v1229_v8, %v1196_v51  ;;  %v1149_v39 = vadd.f32 %v1133_v54, %v1101_v6  ;;  %v1181_v29 = vmul.f32 %v2856_v48, %v2134_v53  ;;  %v1230_v24 = vmul.f32 %v2893_v35, %v2139_v57  ;;  %v1216_v21 = vld [vmem:[#allocation2 + $0x188] sm:$0xff] }
 0x102   : > { %v1356_v9 = vmul.f32 %v2816_v18, %v1340_v49  ;;  %1572 = vst.msk [vmem:[%s2259_s21 + $0xc0] sm:$0xff] %vm283_vm0, %v1387_v31  ;;  %v1278_v44 = vmul.f32 %v2903_v4, %v2141_v58  ;;  %v1053_v33 = vadd.f32 %v1037_v25, %v1005_v34  ;;  %v1086_v60 = vmul.f32 %v2865_v16, %v2128_v46  ;;  %v1264_v49 = vld [vmem:[#allocation2 + $0x189] sm:$0xff] }
 0x103   : > { %v1293_v3 = vadd.f32 %v1277_v2, %v1245_v59  ;;  %v1197_v56 = vadd.f32 %v1181_v29, %v1149_v39  ;;  %v958_v23 = vmul.f32 %v2837_v14, %v2122_v41  ;;  %v990_v17 = vmul.f32 %v2847_v30, %v2124_v42  ;;  %v1311_v2 = vld [vmem:[#allocation2 + $0x182] sm:$0xff] }
 0x104   : > { %v1372_v15 = vadd.f32 %v2834_v1, %v1356_v9  ;;  %v1326_v50 = vmul.f32 %v1310_v22, %v2146_v62  ;;  %v1102_v11 = vadd.f32 %v1086_v60, %v1053_v33  ;;  %v1134_v26 = vmul.f32 %v2875_v36, %v2132_v52 }
 0x105   : > { %v1341_v45 = vadd.f32 %v1325_v55, %v1293_v3  ;;  %v1246_v0 = vadd.f32 %v1230_v24, %v1197_v56  ;;  %v1006_v32 = vadd.f32 %v990_v17, %v958_v23  ;;  %v1038_v5 = vmul.f32 %v2856_v48, %v2126_v43  ;;  %v1312_v56 = vld [vmem:[#allocation2 + $0x18a] sm:$0xff] }
 0x106   : > { %v1388_v27 = vmax.f32 %v1372_v15, 0.0  ;;  %v1150_v14 = vadd.f32 %v1134_v26, %v1102_v11  ;;  %v1182_v30 = vmul.f32 %v2884_v37, %v2134_v53  ;;  %v1231_v63 = vmul.f32 %v1215_v28, %v2139_v57 }
 0x107   : > { %v1357_v61 = vmul.f32 %v2816_v18, %v1341_v45  ;;  %v1294_v38 = vadd.f32 %v1278_v44, %v1246_v0  ;;  %v1279_v7 = vmul.f32 %v1263_v47, %v2141_v58  ;;  %v1054_v10 = vadd.f32 %v1038_v5, %v1006_v32  ;;  %v1217_v44 = vld [vmem:[#allocation2 + $0x198] sm:$0xff]  ;;  %v1218_v5 = vld [vmem:[#allocation2 + $0x1a0] sm:$0xff] }
 0x108   : > { %1573 = vst.msk [vmem:[%s2259_s21 + $0xc8] sm:$0xff] %vm283_vm0, %v1388_v27  ;;  %v1087_v8 = vmul.f32 %v2893_v35, %v2128_v46  ;;  %v1198_v48 = vadd.f32 %v1182_v30, %v1150_v14  ;;  %v959_v40 = vmul.f32 %v2865_v16, %v2122_v41  ;;  %v991_v19 = vmul.f32 %v2875_v36, %v2124_v42 }
 0x109   : > { %v1373_v13 = vadd.f32 %v2834_v1, %v1357_v61  ;;  %v1342_v20 = vadd.f32 %v1326_v50, %v1294_v38  ;;  %v1135_v12 = vmul.f32 %v2903_v4, %v2132_v52  ;;  %v1039_v55 = vmul.f32 %v2884_v37, %v2126_v43  ;;  %v1313_v61 = vld [vmem:[#allocation2 + $0x19a] sm:$0xff] }
 0x10a   : > { %v1103_v51 = vadd.f32 %v1087_v8, %v1054_v10  ;;  %v1247_v54 = vadd.f32 %v1231_v63, %v1198_v48  ;;  %v1007_v31 = vadd.f32 %v991_v19, %v959_v40  ;;  %v1088_v59 = vmul.f32 %v1215_v28, %v2128_v46  ;;  %v1266_v19 = vld [vmem:[#allocation2 + $0x1a1] sm:$0xff] }
 0x10b   : > { %v1389_v6 = vmax.f32 %v1373_v13, 0.0  ;;  %v1358_v16 = vmul.f32 %v2816_v18, %v1342_v20  ;;  %v1327_v34 = vmul.f32 %v1311_v2, %v2146_v62  ;;  %v1183_v25 = vmul.f32 %v1310_v22, %v2134_v53 }
 0x10c   : > { %v1151_v36 = vadd.f32 %v1135_v12, %v1103_v51  ;;  %v1295_v9 = vadd.f32 %v1279_v7, %v1247_v54  ;;  %v1232_v39 = vmul.f32 %v1216_v21, %v2139_v57  ;;  %v1280_v29 = vmul.f32 %v1264_v49, %v2141_v58  ;;  %v1314_v12 = vld [vmem:[#allocation2 + $0x1a2] sm:$0xff] }
 0x10d   : > { %1574 = vst.msk [vmem:[%s2259_s21 + $0xd0] sm:$0xff] %vm283_vm0, %v1389_v6  ;;  %v1055_v37 = vadd.f32 %v1039_v55, %v1007_v31  ;;  %v1374_v24 = vadd.f32 %v2834_v1, %v1358_v16  ;;  %v960_v33 = vmul.f32 %v2893_v35, %v2122_v41  ;;  %v992_v60 = vmul.f32 %v2903_v4, %v2124_v42 }
 0x10e   : > { %v1199_v3 = vadd.f32 %v1183_v25, %v1151_v36  ;;  %v1343_v15 = vadd.f32 %v1327_v34, %v1295_v9  ;;  %v1136_v23 = vmul.f32 %v1263_v47, %v2132_v52  ;;  %v1040_v17 = vmul.f32 %v1310_v22, %v2126_v43  ;;  %v1265_v47 = vld [vmem:[#allocation2 + $0x199] sm:$0xff] }
 0x10f   : > { %v1104_v28 = vadd.f32 %v1088_v59, %v1055_v37  ;;  %v1390_v45 = vmax.f32 %v1374_v24, 0.0  ;;  %v1008_v11 = vadd.f32 %v992_v60, %v960_v33  ;;  %v1089_v26 = vmul.f32 %v1216_v21, %v2128_v46 }
 0x110   : > { %v1248_v50 = vadd.f32 %v1232_v39, %v1199_v3  ;;  %v1359_v27 = vmul.f32 %v2816_v18, %v1343_v15  ;;  %v1184_v41 = vmul.f32 %v1311_v2, %v2134_v53  ;;  %v1233_v35 = vmul.f32 %v1217_v44, %v2139_v57 }
 0x111   : > { %v1152_v0 = vadd.f32 %v1136_v23, %v1104_v28  ;;  %1575 = vst.msk [vmem:[%s2259_s21 + $0xd8] sm:$0xff] %vm283_vm0, %v1390_v45  ;;  %v1328_v4 = vmul.f32 %v1312_v56, %v2146_v62  ;;  %v1056_v43 = vadd.f32 %v1040_v17, %v1008_v11  ;;  %v1137_v30 = vmul.f32 %v1264_v49, %v2132_v52 }
 0x112   : > { %v1296_v42 = vadd.f32 %v1280_v29, %v1248_v50  ;;  %v1375_v22 = vadd.f32 %v2834_v1, %v1359_v27  ;;  %v1281_v7 = vmul.f32 %v1265_v47, %v2141_v58  ;;  %v1185_v13 = vmul.f32 %v1312_v56, %v2134_v53 }
 0x113   : > { %v1200_v32 = vadd.f32 %v1184_v41, %v1152_v0  ;;  %v1105_v14 = vadd.f32 %v1089_v26, %v1056_v43  ;;  %v1234_v48 = vmul.f32 %v1218_v5, %v2139_v57  ;;  %v1329_v40 = vmul.f32 %v1313_v61, %v2146_v62 }
 0x114   : > { %v1344_v46 = vadd.f32 %v1328_v4, %v1296_v42  ;;  %v1391_v63 = vmax.f32 %v1375_v22, 0.0  ;;  %v1282_v53 = vmul.f32 %v1266_v19, %v2141_v58  ;;  %v1330_v6 = vmul.f32 %v1314_v12, %v2146_v62 }
 0x115   : > { %v1249_v38 = vadd.f32 %v1233_v35, %v1200_v32  ;;  %v1153_v8 = vadd.f32 %v1137_v30, %v1105_v14 }
 0x116   : > { %v1360_v10 = vmul.f32 %v2816_v18, %v1344_v46  ;;  %1576 = vst.msk [vmem:[%s2259_s21 + $0xe0] sm:$0xff] %vm283_vm0, %v1391_v63 }
 0x117   : > { %v1297_v2 = vadd.f32 %v1281_v7, %v1249_v38  ;;  %v1201_v20 = vadd.f32 %v1185_v13, %v1153_v8 }
 0x118   : > { %v1376_v52 = vadd.f32 %v2834_v1, %v1360_v10 }
 0x119   : > { %v1345_v51 = vadd.f32 %v1329_v40, %v1297_v2  ;;  %v1250_v49 = vadd.f32 %v1234_v48, %v1201_v20 }
 0x11a   : > { %v1392_v21 = vmax.f32 %v1376_v52, 0.0 }
 0x11b   : > { %v1361_v57 = vmul.f32 %v2816_v18, %v1345_v51  ;;  %v1298_v55 = vadd.f32 %v1282_v53, %v1250_v49 }
 0x11c   : > { %1577 = vst.msk [vmem:[%s2259_s21 + $0xe8] sm:$0xff] %vm283_vm0, %v1392_v21 }
 0x11d   : > { %v1377_v54 = vadd.f32 %v2834_v1, %v1361_v57  ;;  %v1346_v31 = vadd.f32 %v1330_v6, %v1298_v55 }
 0x11f   : > { %v1393_v59 = vmax.f32 %v1377_v54, 0.0  ;;  %v1362_v16 = vmul.f32 %v2816_v18, %v1346_v31 }
 0x121   : > { %1578 = vst.msk [vmem:[%s2259_s21 + $0xf0] sm:$0xff] %vm283_vm0, %v1393_v59  ;;  %v1378_v58 = vadd.f32 %v2834_v1, %v1362_v16 }
 0x123   : > { %v1394_v62 = vmax.f32 %v1378_v58, 0.0 }
 0x125   : > { %1579 = vst.msk [vmem:[%s2259_s21 + $0xf8] sm:$0xff] %vm283_vm0, %v1394_v62 }
 0x126   : > { %1740 = shalt.err (!%p1737_p5)
}
 0x127   : > { %s1741_s14 = scalar_lea.hbm %s2993_s12, 4096  ;;  %s1745_s28 = scalar_lea.hbm %s3050_s4, 8192 }
 0x128   : > { %p1742_p9 = scmp.ne.s32.totalorder %s2993_s12, %s1741_s14  ;;  %p1746_p3 = scmp.lt.u32.totalorder %s2993_s12, %s3050_s4 }
 0x129   : > { %p1747_p7 = scmp.lt.u32.totalorder %s1745_s28, %s1741_s14  ;;  %p1749_p4 = scmp.lt.u32.totalorder %s1741_s14, %s2993_s12 }
 0x12a   : > { %p1743_p1 = pnand %p1742_p9, %p1946_p10 }
 0x12b   : > { %p1748_p13 = por %p1747_p7, %p1746_p3 }
 0x12c   : > { %p1744_p2 = pneg %p1743_p1 }
 0x12d   : > { %p1750_p6 = por %p1749_p4, %p1748_p13 }
 0x12f   : > { %p1751_p8 = pnand %p1750_p6, %p1744_p2 }
 0x131   : > { %1754 = shalt.err (!%p1751_p8)
}
 0x132   : > { %s1823_s30 = smov 128   ;;  %s1824_s9 = smov 8  }
 0x133   : > { %1593 = dma.vmem_to_hbm [thread:$0]  (%p1946_p10), %s2995_s6, 4096, %s2993_s12, %s1413_s29, %s1823_s30, %s1823_s30, %s1824_s9  }
 0x134 PF: > { %s1442_s11 = sand.u32 1, %s1793_s15   ;;  %p3068_p12 = scmp.ne.s32.totalorder %s3058_s26, 0 }
 0x135   : > { %p3069_p11 = scmp.ge.s32.totalorder %s1813_s20, 2  ;;  %s1443_s18 = scalar_lea.sflag [#allocation5], %s1442_s11 }
 0x137   : > { %p1604_p0 = pnand %p3069_p11, %p3068_p12 }
 0x139   : > { %1788 = dma.done.wait (!%p1604_p0), %s1443_s18, 4096  }
 0x13a   : > { %1790 = vsyncadd (!%p1604_p0), %s1443_s18, 4294963200  ;;  %s21_s20 = sadd.s32 1, %s1813_s20   ;;  %s3070_s15 = smov %s1797_s16 }
 0x13b   : > { %p18_p5 = scmp.ge.s32.totalorder %s21_s20, 4   ;;  %s3071_s16 = smov %s1801_s17 }
 0x13c   : > { %s3072_s17 = smov %s1955_s10  ;;  %s3073_s18 = smov %s1809_s19 }
 0x13d   : > { %s3074_s19 = smov %s3076_s5  ;;  %20 = sbr.rel (!%p18_p5) target bundleno = 7 (0x7), region = 99 }
 0x144   :  { %1448 = vsyncpa [#allocation4], 1 }
 0x145   :  { %1450 = vsyncpa [#allocation4 + $0x1], 1 }
 0x146   :  { %1451 = vsyncpa [#allocation7], 1 }
 0x147   :  { %1452 = vsyncpa [#allocation5], 1 }
 0x148   :  { %1454 = vsyncpa [#allocation5 + $0x1], 1 }

</bundles_post_ra>
